<compile_context>
chip_gen: v7x
topology: tpu7x:2x2x1
jax: 0.10.0
libtpu: 0.0.40
codegen_flags: <defaults>
</compile_context>

<pallas_src>
import functools
import math

import jax
import jax.numpy as jnp
from jax.experimental import pallas as pl
from jax.experimental.pallas import tpu as pltpu

# Exact f32 matmuls everywhere (kernel body + pure-JAX reference); avoids the
# bf16-pass default-precision noise that broke the previous correctness check.
jax.config.update("jax_default_matmul_precision", "highest")

# ---- small config consistent with the module ----
BATCH = 2
SEQ = 8
HIDDEN = 32
NUM_HEADS = 4
HEAD_DIM = HIDDEN // NUM_HEADS


def _make_attention_kernel(S, H, NH, HD, vis):
    def kernel(x_ref, wqkv_ref, bqkv_ref, wo_ref, bo_ref, o_ref, *maybe_w):
        w_ref = maybe_w[0] if vis else None

        x = x_ref[0]                                      # (S, H) for this batch
        xh = jnp.broadcast_to(x, (NH, S, H))              # head-batched view

        # Head-major fused QKV projection (scale already folded into q cols).
        qkv = jnp.einsum("hsk,hkd->hsd", xh, wqkv_ref[...],
                         preferred_element_type=jnp.float32) + bqkv_ref[...]
        q = qkv[:, :, :HD]                                # (NH, S, HD)
        k = qkv[:, :, HD:2 * HD]
        v = qkv[:, :, 2 * HD:]

        # Scores / softmax, batched over heads (single leading batch dim).
        s = jnp.einsum("hqd,hkd->hqk", q, k,
                       preferred_element_type=jnp.float32)      # (NH, S, S)
        m = jnp.max(s, axis=-1, keepdims=True)
        e = jnp.exp(s - m)
        p = e / jnp.sum(e, axis=-1, keepdims=True)              # exact softmax

        if vis:
            w_ref[0] = p                                        # (NH, S, S) -> torch layout

        ctx = jnp.einsum("hqk,hkd->hqd", p, v,
                         preferred_element_type=jnp.float32)    # (NH, S, HD)

        # Output projection split along K per head, reduced over heads; single
        # lane-dense (S, H) store at the end (no ctx scratch / column stores).
        out = jnp.einsum("hsd,hdo->hso", ctx, wo_ref[...],
                         preferred_element_type=jnp.float32).sum(axis=0)
        o_ref[0] = out + bo_ref[...]

    return kernel


def prepare_attention_params(p, num_heads):
    """One-time host-side repack: fold the 1/sqrt(HD) scale into q, and lay the
    projection weights out head-major so the kernel needs no reshapes/transposes."""
    H = p["q_w"].shape[0]
    HD = H // num_heads
    scale = 1.0 / math.sqrt(HD)

    def head_major_w(w):   # (H, H_out) -> (NH, H, HD)
        return jnp.transpose(w.reshape(H, num_heads, HD), (1, 0, 2))

    def head_major_b(b):   # (1, H_out) -> (NH, 1, HD)
        return jnp.transpose(b.reshape(1, num_heads, HD), (1, 0, 2))

    wqkv = jnp.concatenate([head_major_w(p["q_w"] * scale),
                            head_major_w(p["k_w"]),
                            head_major_w(p["v_w"])], axis=-1)    # (NH, H, 3*HD)
    bqkv = jnp.concatenate([head_major_b(p["q_b"] * scale),
                            head_major_b(p["k_b"]),
                            head_major_b(p["v_b"])], axis=-1)    # (NH, 1, 3*HD)
    wo = p["o_w"].reshape(num_heads, HD, H)                      # (NH, HD, H)
    return {"wqkv": wqkv, "bqkv": bqkv, "wo": wo, "bo": p["o_b"]}


@functools.partial(jax.jit, static_argnames=("vis",))
def attention(x, fused, vis=True):
    """Pallas equivalent of Attention.forward.

    Returns (attention_output, weights) with weights=None when vis=False.
    Dropout layers are identity (inference).
    """
    B, S, H = x.shape
    NH = fused["wqkv"].shape[0]
    HD = H // NH

    in_specs = [
        pl.BlockSpec((1, S, H), lambda b: (b, 0, 0)),            # x (per batch)
        pl.BlockSpec((NH, H, 3 * HD), lambda b: (0, 0, 0)),      # fused qkv weights
        pl.BlockSpec((NH, 1, 3 * HD), lambda b: (0, 0, 0)),      # fused qkv biases
        pl.BlockSpec((NH, HD, H), lambda b: (0, 0, 0)),          # out-proj weight (head-major)
        pl.BlockSpec((1, H), lambda b: (0, 0)),                  # out-proj bias
    ]

    if vis:
        out_shape = (
            jax.ShapeDtypeStruct((B, S, H), jnp.float32),
            jax.ShapeDtypeStruct((B, NH, S, S), jnp.float32),    # torch layout, no post-transpose
        )
        out_specs = (
            pl.BlockSpec((1, S, H), lambda b: (b, 0, 0)),
            pl.BlockSpec((1, NH, S, S), lambda b: (b, 0, 0, 0)),
        )
    else:
        out_shape = jax.ShapeDtypeStruct((B, S, H), jnp.float32)
        out_specs = pl.BlockSpec((1, S, H), lambda b: (b, 0, 0))

    kernel = _make_attention_kernel(S, H, NH, HD, vis)

    fn = pl.pallas_call(
        kernel,
        out_shape=out_shape,
        grid=(B,),
        in_specs=in_specs,
        out_specs=out_specs,
        # Batch axis is independent: shards across both TensorCores on v7x,
        # negligible per-step overhead on single-TC v5e/v6e.
        compiler_params=pltpu.CompilerParams(dimension_semantics=("parallel",)),
    )
    res = fn(x, fused["wqkv"], fused["bqkv"], fused["wo"], fused["bo"])

    if vis:
        out, w = res
        return out, w
    return res, None


# ---------------- pure-JAX reference (for correctness check) ----------------
def attention_ref(x, p):
    B, S, H = x.shape
    q = x @ p["q_w"] + p["q_b"][0]
    k = x @ p["k_w"] + p["k_b"][0]
    v = x @ p["v_w"] + p["v_b"][0]

    def split(t):
        return t.reshape(B, S, NUM_HEADS, HEAD_DIM).transpose(0, 2, 1, 3)

    qh, kh, vh = split(q), split(k), split(v)
    scores = jnp.einsum("bhqd,bhkd->bhqk", qh, kh) / math.sqrt(HEAD_DIM)
    probs = jax.nn.softmax(scores, axis=-1)
    ctx = jnp.einsum("bhqk,bhkd->bhqd", probs, vh)
    ctx = ctx.transpose(0, 2, 1, 3).reshape(B, S, H)
    out = ctx @ p["o_w"] + p["o_b"][0]
    return out, probs


def init_params(key):
    keys = jax.random.split(key, 8)

    def xavier(k, shape):
        fan_in, fan_out = shape
        limit = math.sqrt(6.0 / (fan_in + fan_out))
        return jax.random.uniform(k, shape, jnp.float32, -limit, limit)

    p = {}
    p["q_w"] = xavier(keys[0], (HIDDEN, HIDDEN))
    p["k_w"] = xavier(keys[1], (HIDDEN, HIDDEN))
    p["v_w"] = xavier(keys[2], (HIDDEN, HIDDEN))
    p["o_w"] = xavier(keys[3], (HIDDEN, HIDDEN))
    p["q_b"] = 0.02 * jax.random.normal(keys[4], (1, HIDDEN), jnp.float32)
    p["k_b"] = 0.02 * jax.random.normal(keys[5], (1, HIDDEN), jnp.float32)
    p["v_b"] = 0.02 * jax.random.normal(keys[6], (1, HIDDEN), jnp.float32)
    p["o_b"] = 0.02 * jax.random.normal(keys[7], (1, HIDDEN), jnp.float32)
    return p


if __name__ == "__main__":
    # TODO(synk): attn_dropout / proj_dropout run as identity (inference mode).
    key = jax.random.PRNGKey(0)
    kx, kp = jax.random.split(key)
    x = jax.random.normal(kx, (BATCH, SEQ, HIDDEN), jnp.float32)
    params = init_params(kp)

    # One-time host-side weight fusion (hoisted out of the per-call path).
    fused = prepare_attention_params(params, NUM_HEADS)
    fused = jax.tree_util.tree_map(jax.block_until_ready, fused)

    out, attn_w = attention(x, fused, vis=True)
    out = jax.block_until_ready(out)
    attn_w = jax.block_until_ready(attn_w)

    ref_out, ref_w = attention_ref(x, params)
    assert jnp.allclose(out, ref_out, atol=2e-4, rtol=2e-4), "output mismatch"
    assert jnp.allclose(attn_w, ref_w, atol=2e-4, rtol=2e-4), "attn weights mismatch"

    # Exercise the weights-skipping (vis=False) path as well.
    out_novis, none_w = attention(x, fused, vis=False)
    out_novis = jax.block_until_ready(out_novis)
    assert none_w is None
    assert jnp.allclose(out_novis, ref_out, atol=2e-4, rtol=2e-4), "vis=False mismatch"

    print("KERNEL_OK")
</pallas_src>

<mosaic_0001>
module attributes {stable_mosaic.version = 11 : i64} {
  func.func @kernel(%arg0: i32, %arg1: memref<1x8x32xf32, #tpu.memory_space<vmem>>, %arg2: memref<4x32x24xf32, #tpu.memory_space<vmem>>, %arg3: memref<4x1x24xf32, #tpu.memory_space<vmem>>, %arg4: memref<4x8x32xf32, #tpu.memory_space<vmem>>, %arg5: memref<1x32xf32, #tpu.memory_space<vmem>>, %arg6: memref<1x8x32xf32, #tpu.memory_space<vmem>>, %arg7: memref<1x4x8x8xf32, #tpu.memory_space<vmem>>) attributes {dimension_semantics = [#tpu.dimension_semantics<parallel>], iteration_bounds = array<i64: 2>, scalar_prefetch = 0 : i64, scratch_operands = 0 : i64, tpu.core_type = #tpu.core_type<tc>, window_params = [{transform_indices = @transform_0, window_bounds = array<i64: 1, 8, 32>}, {pipeline_mode = #tpu.pipeline_mode<synchronous>, transform_indices = @transform_1, window_bounds = array<i64: 4, 32, 24>}, {pipeline_mode = #tpu.pipeline_mode<synchronous>, transform_indices = @transform_2, window_bounds = array<i64: 4, 1, 24>}, {pipeline_mode = #tpu.pipeline_mode<synchronous>, transform_indices = @transform_3, window_bounds = array<i64: 4, 8, 32>}, {pipeline_mode = #tpu.pipeline_mode<synchronous>, transform_indices = @transform_4, window_bounds = array<i64: 1, 32>}, {transform_indices = @transform_5, window_bounds = array<i64: 1, 8, 32>}, {transform_indices = @transform_6, window_bounds = array<i64: 1, 4, 8, 8>}]} {
    %c0 = arith.constant 0 : index
    %c0_0 = arith.constant 0 : index
    %c0_1 = arith.constant 0 : index
    %0 = vector.load %arg1[%c0, %c0_0, %c0_1] : memref<1x8x32xf32, #tpu.memory_space<vmem>>, vector<1x8x32xf32>
    %1 = vector.shape_cast %0 : vector<1x8x32xf32> to vector<8x32xf32>
    %2 = vector.shape_cast %1 : vector<8x32xf32> to vector<1x8x32xf32>
    %3 = vector.broadcast %2 : vector<1x8x32xf32> to vector<4x8x32xf32>
    %c0_2 = arith.constant 0 : index
    %c0_3 = arith.constant 0 : index
    %c0_4 = arith.constant 0 : index
    %4 = vector.load %arg2[%c0_2, %c0_3, %c0_4] : memref<4x32x24xf32, #tpu.memory_space<vmem>>, vector<4x32x24xf32>
    "tpu.trace_start"() <{level = 10 : i32, message = "hsk,hkd->hsd"}> : () -> ()
    %cst = arith.constant dense<0.000000e+00> : vector<4x8x24xf32>
    %5 = tpu.matmul %3, %4, %cst {dimension_numbers = #tpu.dot_dimension_numbers<[2], [1], [1], [2], [0, 0, 0, 1, 1, 2], [0], [0]>, precision = #tpu.contract_precision<fp32>} : vector<4x8x32xf32>, vector<4x32x24xf32>, vector<4x8x24xf32> -> vector<4x8x24xf32>
    "tpu.trace_stop"() : () -> ()
    %c0_5 = arith.constant 0 : index
    %c0_6 = arith.constant 0 : index
    %c0_7 = arith.constant 0 : index
    %6 = vector.load %arg3[%c0_5, %c0_6, %c0_7] : memref<4x1x24xf32, #tpu.memory_space<vmem>>, vector<4x1x24xf32>
    %7 = vector.broadcast %6 : vector<4x1x24xf32> to vector<4x8x24xf32>
    %8 = arith.addf %5, %7 : vector<4x8x24xf32>
    %9 = vector.extract_strided_slice %8 {offsets = [0, 0, 0], sizes = [4, 8, 8], strides = [1, 1, 1]} : vector<4x8x24xf32> to vector<4x8x8xf32>
    %10 = vector.extract_strided_slice %8 {offsets = [0, 0, 8], sizes = [4, 8, 8], strides = [1, 1, 1]} : vector<4x8x24xf32> to vector<4x8x8xf32>
    %11 = vector.extract_strided_slice %8 {offsets = [0, 0, 16], sizes = [4, 8, 8], strides = [1, 1, 1]} : vector<4x8x24xf32> to vector<4x8x8xf32>
    "tpu.trace_start"() <{level = 10 : i32, message = "hqd,hkd->hqk"}> : () -> ()
    %cst_8 = arith.constant dense<0.000000e+00> : vector<4x8x8xf32>
    %12 = tpu.matmul %9, %10, %cst_8 {dimension_numbers = #tpu.dot_dimension_numbers<[2], [2], [1], [1], [0, 0, 0, 1, 1, 1], [0], [0]>, precision = #tpu.contract_precision<fp32>} : vector<4x8x8xf32>, vector<4x8x8xf32>, vector<4x8x8xf32> -> vector<4x8x8xf32>
    "tpu.trace_stop"() : () -> ()
    %cst_9 = arith.constant dense<0xFF800000> : vector<4x8xf32>
    %13 = vector.multi_reduction <maximumf>, %12, %cst_9 [2] : vector<4x8x8xf32> to vector<4x8xf32>
    %14 = vector.shape_cast %13 : vector<4x8xf32> to vector<4x8x1xf32>
    %15 = vector.broadcast %14 : vector<4x8x1xf32> to vector<4x8x8xf32>
    %16 = arith.subf %12, %15 : vector<4x8x8xf32>
    %17 = math.exp %16 : vector<4x8x8xf32>
    %cst_10 = arith.constant dense<0.000000e+00> : vector<4x8xf32>
    %18 = vector.multi_reduction <add>, %17, %cst_10 [2] : vector<4x8x8xf32> to vector<4x8xf32>
    %19 = vector.shape_cast %18 : vector<4x8xf32> to vector<4x8x1xf32>
    %20 = vector.broadcast %19 : vector<4x8x1xf32> to vector<4x8x8xf32>
    %21 = arith.divf %17, %20 : vector<4x8x8xf32>
    %c0_11 = arith.constant 0 : index
    %c0_12 = arith.constant 0 : index
    %c0_13 = arith.constant 0 : index
    %c0_14 = arith.constant 0 : index
    %22 = vector.load %arg7[%c0_11, %c0_12, %c0_13, %c0_14] : memref<1x4x8x8xf32, #tpu.memory_space<vmem>>, vector<1x4x8x8xf32>
    %23 = vector.shape_cast %22 : vector<1x4x8x8xf32> to vector<4x8x8xf32>
    %24 = vector.shape_cast %21 : vector<4x8x8xf32> to vector<1x4x8x8xf32>
    tpu.vector_store %arg7[%c0_11, %c0_12, %c0_13, %c0_14], %24 {strides = array<i32>} : memref<1x4x8x8xf32, #tpu.memory_space<vmem>>, vector<1x4x8x8xf32>,
    "tpu.trace_start"() <{level = 10 : i32, message = "hqk,hkd->hqd"}> : () -> ()
    %cst_15 = arith.constant dense<0.000000e+00> : vector<4x8x8xf32>
    %25 = tpu.matmul %21, %11, %cst_15 {dimension_numbers = #tpu.dot_dimension_numbers<[2], [1], [1], [2], [0, 0, 0, 1, 1, 2], [0], [0]>, precision = #tpu.contract_precision<fp32>} : vector<4x8x8xf32>, vector<4x8x8xf32>, vector<4x8x8xf32> -> vector<4x8x8xf32>
    "tpu.trace_stop"() : () -> ()
    %c0_16 = arith.constant 0 : index
    %c0_17 = arith.constant 0 : index
    %c0_18 = arith.constant 0 : index
    %26 = vector.load %arg4[%c0_16, %c0_17, %c0_18] : memref<4x8x32xf32, #tpu.memory_space<vmem>>, vector<4x8x32xf32>
    "tpu.trace_start"() <{level = 10 : i32, message = "hsd,hdo->hso"}> : () -> ()
    %cst_19 = arith.constant dense<0.000000e+00> : vector<4x8x32xf32>
    %27 = tpu.matmul %25, %26, %cst_19 {dimension_numbers = #tpu.dot_dimension_numbers<[2], [1], [1], [2], [0, 0, 0, 1, 1, 2], [0], [0]>, precision = #tpu.contract_precision<fp32>} : vector<4x8x8xf32>, vector<4x8x32xf32>, vector<4x8x32xf32> -> vector<4x8x32xf32>
    "tpu.trace_stop"() : () -> ()
    %cst_20 = arith.constant dense<0.000000e+00> : vector<8x32xf32>
    %28 = vector.multi_reduction <add>, %27, %cst_20 [0] : vector<4x8x32xf32> to vector<8x32xf32>
    %c0_21 = arith.constant 0 : index
    %c0_22 = arith.constant 0 : index
    %29 = vector.load %arg5[%c0_21, %c0_22] : memref<1x32xf32, #tpu.memory_space<vmem>>, vector<1x32xf32>
    %30 = vector.broadcast %29 : vector<1x32xf32> to vector<8x32xf32>
    %31 = arith.addf %28, %30 : vector<8x32xf32>
    %c0_23 = arith.constant 0 : index
    %c0_24 = arith.constant 0 : index
    %c0_25 = arith.constant 0 : index
    %32 = vector.load %arg6[%c0_23, %c0_24, %c0_25] : memref<1x8x32xf32, #tpu.memory_space<vmem>>, vector<1x8x32xf32>
    %33 = vector.shape_cast %32 : vector<1x8x32xf32> to vector<8x32xf32>
    %34 = vector.shape_cast %31 : vector<8x32xf32> to vector<1x8x32xf32>
    tpu.vector_store %arg6[%c0_23, %c0_24, %c0_25], %34 {strides = array<i32>} : memref<1x8x32xf32, #tpu.memory_space<vmem>>, vector<1x8x32xf32>,
    return
  }
  func.func @transform_0(%arg0: i32) -> (i32, i32, i32) {
    %c0_i32 = arith.constant 0 : i32
    %c0_i32_0 = arith.constant 0 : i32
    %c0_i32_1 = arith.constant 0 : i32
    return %arg0, %c0_i32, %c0_i32_0 : i32, i32, i32
  }
  func.func @transform_1(%arg0: i32) -> (i32, i32, i32) {
    %c0_i32 = arith.constant 0 : i32
    %c0_i32_0 = arith.constant 0 : i32
    %c0_i32_1 = arith.constant 0 : i32
    %c0_i32_2 = arith.constant 0 : i32
    return %c0_i32, %c0_i32_0, %c0_i32_1 : i32, i32, i32
  }
  func.func @transform_2(%arg0: i32) -> (i32, i32, i32) {
    %c0_i32 = arith.constant 0 : i32
    %c0_i32_0 = arith.constant 0 : i32
    %c0_i32_1 = arith.constant 0 : i32
    %c0_i32_2 = arith.constant 0 : i32
    return %c0_i32, %c0_i32_0, %c0_i32_1 : i32, i32, i32
  }
  func.func @transform_3(%arg0: i32) -> (i32, i32, i32) {
    %c0_i32 = arith.constant 0 : i32
    %c0_i32_0 = arith.constant 0 : i32
    %c0_i32_1 = arith.constant 0 : i32
    %c0_i32_2 = arith.constant 0 : i32
    return %c0_i32, %c0_i32_0, %c0_i32_1 : i32, i32, i32
  }
  func.func @transform_4(%arg0: i32) -> (i32, i32) {
    %c0_i32 = arith.constant 0 : i32
    %c0_i32_0 = arith.constant 0 : i32
    %c0_i32_1 = arith.constant 0 : i32
    return %c0_i32, %c0_i32_0 : i32, i32
  }
  func.func @transform_5(%arg0: i32) -> (i32, i32, i32) {
    %c0_i32 = arith.constant 0 : i32
    %c0_i32_0 = arith.constant 0 : i32
    %c0_i32_1 = arith.constant 0 : i32
    return %arg0, %c0_i32, %c0_i32_0 : i32, i32, i32
  }
  func.func @transform_6(%arg0: i32) -> (i32, i32, i32, i32) {
    %c0_i32 = arith.constant 0 : i32
    %c0_i32_0 = arith.constant 0 : i32
    %c0_i32_1 = arith.constant 0 : i32
    %c0_i32_2 = arith.constant 0 : i32
    return %arg0, %c0_i32, %c0_i32_0, %c0_i32_1 : i32, i32, i32, i32
  }
}

</mosaic_0001>

<bundles_post_ra>
// kernel: attention.1
= control target key start
LH: loop header
LB: loop body
LE: loop exit
PB: predicated region body
PF: predicated region fallthrough
CT: control target
= control target key end

     0   :  { %12 = vsyncpa [#allocation3], 0  ;;  %s10190_s0 = inlined_call_operand.vmem [shape: f32[2,8,32], index: 0, kind: input, shape index: {}]   ;;  %s10191_s1 = inlined_call_operand.vmem [shape: f32[4,32,24], index: 1, kind: input, shape index: {}]   ;;  %s10192_s2 = inlined_call_operand.vmem [shape: f32[4,1,24], index: 2, kind: input, shape index: {}]   ;;  %s10193_s3 = inlined_call_operand.vmem [shape: f32[4,8,32], index: 3, kind: input, shape index: {}]   ;;  %s10194_s4 = inlined_call_operand.vmem [shape: f32[1,32], index: 4, kind: input, shape index: {}]   ;;  %s10195_s5 = inlined_call_operand.hbm [shape: f32[2,8,32], index: 5, kind: output, shape index: {0}]   ;;  %s10196_s6 = inlined_call_operand.hbm [shape: f32[2,4,8,8], index: 6, kind: output, shape index: {1}]  }
   0x1   :  { %14 = vsyncpa [#allocation3 + $0x1], 0 }
   0x2   :  { %15 = vsyncpa [#allocation5], 0 }
   0x3   :  { %17 = vsyncpa [#allocation5 + $0x1], 0  ;;  %s9281_s21 = smov 0   ;;  %s9283_s22 = smov 0  }
   0x4   :  { %s9285_s23 = smov 0   ;;  %s9287_s24 = smov 0  }
   0x5 LB: > { %s9302_s25 = sadd.s32 4294967295, %s9235_s24   ;;  %s7858_s26 = sadd.s32 4294967294, %s9235_s24   ;;  %s9235_s24 = sphi %s9287_s24, %s10202_s24   ;;  %s9231_s23 = sphi %s9285_s23, %s10201_s23   ;;  %s9227_s22 = sphi %s9283_s22, %s10200_s22   ;;  %s9223_s21 = sphi %s9281_s21, %s10199_s21  }
   0x6   : > { %s9306_s27 = sadd.s32 1, %s9235_s24   ;;  %s140_s28 = sadd.s32 1, %s9231_s23 }
   0x7   : > { %s137_s29 = ssub.s32 %s9235_s24, %s9306_s27  ;;  %p150_p0 = scmp.ne.s32.totalorder %s9231_s23, %s9227_s22 }
   0x8   : > { %p138_p1 = scmp.eq.s32.totalorder %s137_s29, 0  ;;  %p151_p2 = scmp.eq.s32.totalorder %s9302_s25, 1 }
   0x9   : > { %p156_p3 = scmp.ne.s32.totalorder %s9227_s22, %s9223_s21  ;;  %p157_p4 = scmp.eq.s32.totalorder %s7858_s26, 1 }
   0xa   : > { %s9317_s30 = scalar_select %p138_p1, %s9231_s23, %s140_s28  }
   0xb   : > { %p9319_p5 = por %p151_p2, %p150_p0  ;;  %p9323_p6 = por %p157_p4, %p156_p3 }
   0xc   : > { %p7861_p7 = scmp.ge.s32.totalorder %s9235_s24, 1  ;;  %p220_p8 = scmp.lt.s32.totalorder %s9235_s24, 3 }
   0xe   : > { %p221_p9 = pnand %p7861_p7, %p220_p8 }
   0xf   : > { %v259_v0 = vld [vmem:[%s10191_s1] sm:$0xff] (!%p221_p9)  ;;  %v260_v1 = vld [vmem:[%s10191_s1 + $0x8] sm:$0xff] (!%p221_p9)  ;;  %v9237_v3 = vmov (!%p221_p9), 0.0|0.0   ;;  %v261_v8 = vld [vmem:[%s10191_s1 + $0x10] sm:$0xff] (!%p221_p9)  ;;  %vm9238_vm0 = vmmov (!%p221_p9), 0   ;;  %v9239_v15 = vmov (!%p221_p9), 0.0  }
  0x10   : > { %224 = sbr.rel (%p221_p9) target bundleno = 1582 (0x62e), region = 40  ;;  %v263_v2 = vld [vmem:[%s10191_s1 + $0x20] sm:$0xff] (!%p221_p9)  ;;  %8766 = vmatprep.subr.bf16.mxu0 (!%p221_p9), %v9237_v3  ;;  %8802 = vmatprep.subr.bf16.mxu1 (!%p221_p9), %v9237_v3  ;;  %v308_v4 = vand.u32 (!%p221_p9), 4294901760, %v259_v0  ;;  %v311_v5 = vand.u32 (!%p221_p9), 4294901760, %v260_v1  ;;  %v264_v6 = vld [vmem:[%s10191_s1 + $0x28] sm:$0xff] (!%p221_p9)  ;;  %v262_v9 = vld [vmem:[%s10191_s1 + $0x18] sm:$0xff] (!%p221_p9) }
  0x11   : > { %v793_v7 = vand.u32 (!%p221_p9), 4294901760, %v263_v2  ;;  %v796_v10 = vand.u32 (!%p221_p9), 4294901760, %v264_v6  ;;  %v314_v11 = vand.u32 (!%p221_p9), 4294901760, %v261_v8  ;;  %v317_v12 = vand.u32 (!%p221_p9), 4294901760, %v262_v9  ;;  %v265_v13 = vld [vmem:[%s10191_s1 + $0x30] sm:$0xff] (!%p221_p9)  ;;  %v266_v14 = vld [vmem:[%s10191_s1 + $0x38] sm:$0xff] (!%p221_p9)  ;;  %8150 = vmatprep.mubr.msk.f32.mxu0 (!%p221_p9), %vm9238_vm0, %v9239_v15  ;;  %8216 = vmatprep.mubr.msk.f32.mxu1 (!%p221_p9), %vm9238_vm0, %v9239_v15 }
  0x12   : > { %p254_p10 = scmp.lt.s32.totalorder (!%p221_p9), %s9302_s25, 1  ;;  %v9360_v16 = vpack.c.bf16 (!%p221_p9), %v311_v5, %v308_v4  ;;  %v9362_v17 = vsub.f32 (!%p221_p9), %v259_v0, %v308_v4  ;;  %v9364_v18 = vsub.f32 (!%p221_p9), %v260_v1, %v311_v5  ;;  %v799_v25 = vand.u32 (!%p221_p9), 4294901760, %v265_v13  ;;  %s9240_s20 = smov (!%p221_p9), 120  }
  0x13   : > { %v9366_v19 = vsub.f32 (!%p221_p9), %v263_v2, %v793_v7  ;;  %v9368_v20 = vpack.c.bf16 (!%p221_p9), %v796_v10, %v793_v7  ;;  %v9370_v21 = vsub.f32 (!%p221_p9), %v264_v6, %v796_v10  ;;  %v9372_v22 = vpack.c.bf16 (!%p221_p9), %v317_v12, %v314_v11  ;;  %v271_v10 = vld [vmem:[%s10191_s1 + $0x60] sm:$0xff] (!%p221_p9)  ;;  %s7877_s29 = sshll.u32 (!%p221_p9), %s9302_s25, 9  ;;  %s9242_s16 = smov (!%p221_p9), [#allocation4]  }
  0x14   : > { %v9374_v23 = vsub.f32 (!%p221_p9), %v261_v8, %v314_v11  ;;  %8768 = vmatpush3.bf16.msra.mxu0 (!%p221_p9), %v9360_v16  ;;  %v9378_v24 = vsub.f32 (!%p221_p9), %v262_v9, %v317_v12  ;;  %v802_v26 = vand.u32 (!%p221_p9), 4294901760, %v266_v14  ;;  %vm303_vm1 = vcmask (!%p221_p9), 261120   ;;  %v267_v8 = vld [vmem:[%s10191_s1 + $0x40] sm:$0xff] (!%p221_p9)  ;;  %v268_v9 = vld [vmem:[%s10191_s1 + $0x48] sm:$0xff] (!%p221_p9)  ;;  %s9145_s17 = sshll.u32 (!%p221_p9), %s9242_s16, 4  ;;  %s9146_s17 = int_to_ptr.vmem [resolvable:$false] %s9145_s17 }
  0x15   : > { %8804 = vmatpush3.bf16.msra.mxu1 (!%p221_p9), %v9368_v20  ;;  %8769 = vmatprep.subr.bf16.mxu0 (!%p221_p9), %v9237_v3  ;;  %v389_v27 = vand.u32 (!%p221_p9), 4294901760, %v9362_v17  ;;  %v396_v28 = vand.u32 (!%p221_p9), 4294901760, %v9364_v18  ;;  %v874_v29 = vand.u32 (!%p221_p9), 4294901760, %v9366_v19  ;;  %v881_v30 = vand.u32 (!%p221_p9), 4294901760, %v9370_v21  ;;  %v272_v11 = vld [vmem:[%s10191_s1 + $0x68] sm:$0xff] (!%p221_p9) }
  0x16   : > { %8805 = vmatprep.subr.bf16.mxu1 (!%p221_p9), %v9237_v3  ;;  %v9387_v31 = vpack.c.bf16 (!%p221_p9), %v802_v26, %v799_v25  ;;  %v9389_v32 = vsub.f32 (!%p221_p9), %v265_v13, %v799_v25  ;;  %v403_v33 = vand.u32 (!%p221_p9), 4294901760, %v9374_v23  ;;  %v9395_v34 = vsub.f32 (!%p221_p9), %v266_v14, %v802_v26  ;;  %v270_v25 = vld [vmem:[%s10191_s1 + $0x58] sm:$0xff] (!%p221_p9) }
  0x17   : > { %s255_s10 = scalar_select %p254_p10, %s9302_s25, 1  ;;  %v390_v36 = vsub.f32 %v9362_v17, %v389_v27  ;;  %v397_v37 = vsub.f32 %v9364_v18, %v396_v28  ;;  %v875_v38 = vsub.f32 %v9366_v19, %v874_v29  ;;  %v882_v40 = vsub.f32 %v9370_v21, %v881_v30 }
  0x18   : > { %8771 = vmatpush3.bf16.msra.mxu0 %v9372_v22  ;;  %v410_v41 = vand.u32 4294901760, %v9378_v24  ;;  %v888_v42 = vand.u32 4294901760, %v9389_v32  ;;  %v404_v44 = vsub.f32 %v9374_v23, %v403_v33  ;;  %v895_v48 = vand.u32 4294901760, %v9395_v34 }
  0x19   : > { %s7864_s11 = sshll.u32 %s255_s10, 3  ;;  %8807 = vmatpush3.bf16.msra.mxu1 %v9387_v31  ;;  %8772 = vmatprep.subr.bf16.mxu0 %v9237_v3  ;;  %v391_v46 = vand.u32 4294901760, %v390_v36  ;;  %v398_v47 = vand.u32 4294901760, %v397_v37  ;;  %v876_v49 = vand.u32 4294901760, %v875_v38  ;;  %v883_v50 = vand.u32 4294901760, %v882_v40  ;;  %s9241_s10 = smov 112  }
  0x1a   : > { %s257_s14 = scalar_lea.vmem %s10190_s0, %s7864_s11  ;;  %8808 = vmatprep.subr.bf16.mxu1 %v9237_v3  ;;  %v411_v51 = vsub.f32 %v9378_v24, %v410_v41  ;;  %v889_v52 = vsub.f32 %v9389_v32, %v888_v42  ;;  %v896_v54 = vsub.f32 %v9395_v34, %v895_v48  ;;  %v405_v57 = vand.u32 4294901760, %v404_v44  ;;  %s9858_s11 = sand.u32 1, %s9227_s22  }
  0x1b   : > { %v258_v35 = vld [vmem:[%s257_s14] sm:$0xff]  ;;  %v8773_v56 = vpack.c.bf16 %v398_v47, %v391_v46  ;;  %v8809_v58 = vpack.c.bf16 %v883_v50, %v876_v49  ;;  %v8779_v1 = vpack.c.bf16 %v9364_v18, %v9362_v17  ;;  %v8815_v2 = vpack.c.bf16 %v9370_v21, %v9366_v19  ;;  %v269_v21 = vld [vmem:[%s10191_s1 + $0x50] sm:$0xff]  ;;  %s7863_s12 = sshll.u32 %s9858_s11, 5  ;;  %s7738_s14 = scalar_lea.sflag [#allocation5], %s9858_s11 }
  0x1c   : > { %v305_v39 = vsel %vm303_vm1, %v258_v35, 0  ;;  %v412_v59 = vand.u32 4294901760, %v411_v51  ;;  %v890_v60 = vand.u32 4294901760, %v889_v52  ;;  %v897_v61 = vand.u32 4294901760, %v896_v54  ;;  %s9869_s13 = scalar_lea.vmem [#allocation4], %s7863_s12  ;;  %s10108_s12 = scalar_lea.hbm %s10196_s6, %s7877_s29 }
  0x1d   : > { %v9415_v43 = vand.u32 4294901760, %v305_v39  ;;  %v8782_v4 = vpack.c.bf16 %v9378_v24, %v9374_v23  ;;  %v8818_v5 = vpack.c.bf16 %v9395_v34, %v9389_v32  ;;  %v8791_v6 = vpack.c.bf16 %v396_v28, %v389_v27  ;;  %v273_v23 = vld [vmem:[%s10191_s1 + $0x70] sm:$0xff]  ;;  %v274_v24 = vld [vmem:[%s10191_s1 + $0x78] sm:$0xff]  ;;  %s7764_s28 = sshll.u32 %s9869_s13, 4  ;;  %s10103_s28 = int_to_ptr.vmem [resolvable:$true] %s7764_s28 }
  0x1e   : > { %v8776_v63 = vpack.c.bf16 %v412_v59, %v405_v57  ;;  %v8812_v0 = vpack.c.bf16 %v897_v61, %v890_v60  ;;  %v8827_v7 = vpack.c.bf16 %v881_v30, %v874_v29  ;;  %v1278_v12 = vand.u32 4294901760, %v267_v8  ;;  %s9141_s15 = scalar_lea.vmem %s10103_s28, 512  ;;  %p9148_p0 = scmp.lt.s32.totalorder %s10103_s28, %s9146_s17 }
  0x1f   : > { %v9422_v45 = vsub.f32 %v305_v39, %v9415_v43  ;;  %v1281_v13 = vand.u32 4294901760, %v268_v9  ;;  %v8794_v14 = vpack.c.bf16 %v410_v41, %v403_v33  ;;  %v8830_v17 = vpack.c.bf16 %v895_v48, %v888_v42  ;;  %p9142_p11 = scmp.ne.s32.totalorder %s10103_s28, %s9141_s15 }
  0x20   : > { %v1763_v18 = vand.u32 4294901760, %v271_v10  ;;  %v1766_v19 = vand.u32 4294901760, %v272_v11  ;;  %v9531_v26 = vsub.f32 %v267_v8, %v1278_v12  ;;  %v1284_v28 = vand.u32 4294901760, %v269_v21 }
  0x21   : > { %v9432_v53 = vand.u32 4294901760, %v9422_v45  ;;  %v9533_v27 = vsub.f32 %v268_v9, %v1281_v13  ;;  %v1287_v29 = vand.u32 4294901760, %v270_v25  ;;  %v1769_v33 = vand.u32 4294901760, %v273_v23  ;;  %p9143_p12 = pnand %p9142_p11, %p9319_p5 }
  0x22   : > { %v9535_v30 = vsub.f32 %v271_v10, %v1763_v18  ;;  %v9537_v32 = vsub.f32 %v272_v11, %v1766_v19  ;;  %v1772_v34 = vand.u32 4294901760, %v274_v24  ;;  %v9543_v35 = vsub.f32 %v269_v21, %v1284_v28 }
  0x23   : > { %v379_v55 = vsub.f32 %v9422_v45, %v9432_v53  ;;  %v9545_v36 = vsub.f32 %v270_v25, %v1287_v29  ;;  %v1359_v37 = vand.u32 4294901760, %v9531_v26  ;;  %v1366_v38 = vand.u32 4294901760, %v9533_v27  ;;  %v7867_v25 = vld [vmem:[%s10192_s2 + $0x2] ss:$0 sm:$0xff]  ;;  %p9144_p13 = pneg %p9143_p12 }
  0x24   : > { %v9551_v39 = vsub.f32 %v273_v23, %v1769_v33  ;;  %v9553_v40 = vsub.f32 %v274_v24, %v1772_v34  ;;  %v1844_v41 = vand.u32 4294901760, %v9535_v30  ;;  %v1851_v42 = vand.u32 4294901760, %v9537_v32 }
  0x25   : > { %v9439_v62 = vand.u32 4294901760, %v379_v55  ;;  %v1360_v44 = vsub.f32 %v9531_v26, %v1359_v37  ;;  %v1367_v46 = vsub.f32 %v9533_v27, %v1366_v38  ;;  %v1373_v47 = vand.u32 4294901760, %v9543_v35 }
  0x26   : > { %v1380_v48 = vand.u32 4294901760, %v9545_v36  ;;  %v1845_v49 = vsub.f32 %v9535_v30, %v1844_v41  ;;  %v1852_v50 = vsub.f32 %v9537_v32, %v1851_v42  ;;  %v1858_v51 = vand.u32 4294901760, %v9551_v39 }
  0x27   : > { %8151 = vmatmul.mubr.f32.vlgmr.msra.gmra.mrb[0].mxu0 %v9439_v62  ;;  %8217 = vmatmul.mubr.f32.vlgmr.msra.gmra.mrb[0].mxu1 %v9439_v62  ;;  %v1865_v52 = vand.u32 4294901760, %v9553_v40  ;;  %v9587_v54 = vpack.c.bf16 %v1287_v29, %v1284_v28  ;;  %v1368_v55 = vand.u32 4294901760, %v1367_v46  ;;  %v8851_v8 = vpack.c.bf16 %v9533_v27, %v9531_v26  ;;  %v7868_v29 = vld [vmem:[%s10192_s2 + $0x3] ss:$0 sm:$0xff] }
  0x28   : > { %8774 = vmatpush3.bf16.msra.mxu0 %v8773_v56  ;;  %8810 = vmatpush3.bf16.msra.mxu1 %v8809_v58  ;;  %v1374_v56 = vsub.f32 %v9543_v35, %v1373_v47  ;;  %v1381_v57 = vsub.f32 %v9545_v36, %v1380_v48  ;;  %v1846_v58 = vand.u32 4294901760, %v1845_v49  ;;  %v1853_v59 = vand.u32 4294901760, %v1852_v50 }
  0x29   : > { %8775 = vmatprep.subr.bf16.mxu0 %v9237_v3  ;;  %8811 = vmatprep.subr.bf16.mxu1 %v9237_v3  ;;  %v1859_v60 = vsub.f32 %v9551_v39, %v1858_v51  ;;  %v1866_v61 = vsub.f32 %v9553_v40, %v1865_v52  ;;  %v8854_v9 = vpack.c.bf16 %v9545_v36, %v9543_v35  ;;  %vm2250_vm2 = vcmask 64512  }
  0x2a   : > { %8161 = vmatprep.mubr.msk.f32.mxu0 %vm9238_vm0, %v9239_v15  ;;  %8227 = vmatprep.mubr.msk.f32.mxu1 %vm9238_vm0, %v9239_v15  ;;  %v8890_v10 = vpack.c.bf16 %v9553_v40, %v9551_v39  ;;  %v8899_v11 = vpack.c.bf16 %v1851_v42, %v1844_v41 }
  0x2c   : > { %8777 = vmatpush3.bf16.msra.mxu0 %v8776_v63  ;;  %8813 = vmatpush3.bf16.msra.mxu1 %v8812_v0  ;;  %v1375_v63 = vand.u32 4294901760, %v1374_v56  ;;  %v1382_v0 = vand.u32 4294901760, %v1381_v57 }
  0x2d   : > { %8778 = vmatprep.subr.bf16.mxu0 %v9237_v3  ;;  %8814 = vmatprep.subr.bf16.mxu1 %v9237_v3 }
  0x2f   : > { %8162 = vmatmul.mubr.f32.vlgmr.msra.gmra.mrb[0].mxu0 %v9415_v43  ;;  %8228 = vmatmul.mubr.f32.vlgmr.msra.gmra.mrb[0].mxu1 %v9415_v43 }
  0x30   : > { %8780 = vmatpush3.bf16.msra.mxu0 %v8779_v1  ;;  %8816 = vmatpush3.bf16.msra.mxu1 %v8815_v2  ;;  %v8881_v2 = vpack.c.bf16 %v1853_v59, %v1846_v58 }
  0x31   : > { %8781 = vmatprep.subr.bf16.mxu0 %v9237_v3  ;;  %8817 = vmatprep.subr.bf16.mxu1 %v9237_v3 }
  0x32   : > { %8172 = vmatprep.mubr.msk.f32.mxu0 %vm9238_vm0, %v9239_v15  ;;  %8238 = vmatprep.mubr.msk.f32.mxu1 %vm9238_vm0, %v9239_v15 }
  0x34   : > { %8783 = vmatpush3.bf16.msra.mxu0 %v8782_v4  ;;  %8819 = vmatpush3.bf16.msra.mxu1 %v8818_v5  ;;  %v1860_v4 = vand.u32 4294901760, %v1859_v60  ;;  %v1867_v5 = vand.u32 4294901760, %v1866_v61 }
  0x35   : > { %8784 = vmatprep.subr.bf16.mxu0 %v9237_v3  ;;  %8820 = vmatprep.subr.bf16.mxu1 %v9237_v3 }
  0x37   : > { %8173 = vmatmul.mubr.f32.vlgmr.msra.gmra.mrb[0].mxu0 %v9422_v45  ;;  %8239 = vmatmul.mubr.f32.vlgmr.msra.gmra.mrb[0].mxu1 %v9422_v45 }
  0x38   : > { %8786 = vmatpush3.bf16.msra.mxu0 %v9360_v16  ;;  %8822 = vmatpush3.bf16.msra.mxu1 %v9368_v20 }
  0x39   : > { %8787 = vmatprep.subr.bf16.mxu0 %v9237_v3  ;;  %8823 = vmatprep.subr.bf16.mxu1 %v9237_v3 }
  0x3a   : > { %8183 = vmatprep.mubr.msk.f32.mxu0 %vm9238_vm0, %v9239_v15  ;;  %8249 = vmatprep.mubr.msk.f32.mxu1 %vm9238_vm0, %v9239_v15 }
  0x3c   : > { %8789 = vmatpush3.bf16.msra.mxu0 %v9372_v22  ;;  %8825 = vmatpush3.bf16.msra.mxu1 %v9387_v31 }
  0x3d   : > { %8790 = vmatprep.subr.bf16.mxu0 %v9237_v3  ;;  %8826 = vmatprep.subr.bf16.mxu1 %v9237_v3 }
  0x3f   : > { %8184 = vmatmul.mubr.f32.vlgmr.msra.gmra.mrb[0].mxu0 %v9432_v53  ;;  %8250 = vmatmul.mubr.f32.vlgmr.msra.gmra.mrb[0].mxu1 %v9432_v53 }
  0x40   : > { %8792 = vmatpush3.bf16.msra.mxu0 %v8791_v6  ;;  %8828 = vmatpush3.bf16.msra.mxu1 %v8827_v7  ;;  %v8848_v6 = vpack.c.bf16 %v1382_v0, %v1375_v63  ;;  %v8884_v7 = vpack.c.bf16 %v1867_v5, %v1860_v4 }
  0x41   : > { %8793 = vmatprep.subr.bf16.mxu0 %v9237_v3  ;;  %8829 = vmatprep.subr.bf16.mxu1 %v9237_v3 }
  0x42   : > { %8194 = vmatprep.mubr.msk.f32.mxu0 %vm9238_vm0, %v9239_v15  ;;  %8260 = vmatprep.mubr.msk.f32.mxu1 %vm9238_vm0, %v9239_v15 }
  0x44   : > { %8795 = vmatpush3.bf16.msra.mxu0 %v8794_v14  ;;  %8831 = vmatpush3.bf16.msra.mxu1 %v8830_v17 }
  0x45   : > { %8796 = vmatprep.subr.bf16.mxu0 %v9237_v3  ;;  %8832 = vmatprep.subr.bf16.mxu1 %v9237_v3 }
  0x47   : > { %8195 = vmatmul.mubr.f32.vlgmr.msra.gmra.mrb[0].mxu0 %v9415_v43  ;;  %8261 = vmatmul.mubr.f32.vlgmr.msra.gmra.mrb[0].mxu1 %v9415_v43 }
  0x48   : > { %8798 = vmatpush3.bf16.msra.mxu0 %v9360_v16  ;;  %8834 = vmatpush3.bf16.msra.mxu1 %v9368_v20  ;;  %v9563_v16 = vpack.c.bf16 %v1281_v13, %v1278_v12  ;;  %v9565_v20 = vpack.c.bf16 %v1766_v19, %v1763_v18  ;;  %v8866_v12 = vpack.c.bf16 %v1380_v48, %v1373_v47 }
  0x49   : > { %8799 = vmatprep.subr.bf16.mxu0 %v9237_v3  ;;  %8835 = vmatprep.subr.bf16.mxu1 %v9237_v3  ;;  %v8902_v13 = vpack.c.bf16 %v1865_v52, %v1858_v51 }
  0x4a   : > { %8205 = vmatprep.mubr.msk.f32.mxu0 %vm9238_vm0, %v9239_v15  ;;  %8271 = vmatprep.mubr.msk.f32.mxu1 %vm9238_vm0, %v9239_v15 }
  0x4c   : > { %8801 = vmatpush3.bf16.msra.mxu0 %v9372_v22  ;;  %8837 = vmatpush3.bf16.msra.mxu1 %v9387_v31  ;;  %v9589_v22 = vpack.c.bf16 %v1772_v34, %v1769_v33  ;;  %v1361_v31 = vand.u32 4294901760, %v1360_v44 }
  0x4d   : > { %8838 = vmatprep.subr.bf16.mxu0 %v9237_v3  ;;  %8874 = vmatprep.subr.bf16.mxu1 %v9237_v3 }
  0x4e   : > { %v8845_v1 = vpack.c.bf16 %v1368_v55, %v1361_v31 }
  0x4f   : > { %8206 = vmatmul.mubr.f32.vlgmr.msra.gmra.mrb[0].mxu0 %v9415_v43  ;;  %8272 = vmatmul.mubr.f32.vlgmr.msra.gmra.mrb[0].mxu1 %v9415_v43 }
  0x50   : > { %8840 = vmatpush3.bf16.msra.mxu0 %v9563_v16  ;;  %8876 = vmatpush3.bf16.msra.mxu1 %v9565_v20 }
  0x51   : > { %8841 = vmatprep.subr.bf16.mxu0 %v9237_v3  ;;  %8877 = vmatprep.subr.bf16.mxu1 %v9237_v3 }
  0x52   : > { %8282 = vmatprep.mubr.msk.f32.mxu0 %vm9238_vm0, %v9239_v15  ;;  %8348 = vmatprep.mubr.msk.f32.mxu1 %vm9238_vm0, %v9239_v15 }
  0x54   : > { %8843 = vmatpush3.bf16.msra.mxu0 %v9587_v54  ;;  %8879 = vmatpush3.bf16.msra.mxu1 %v9589_v22 }
  0x55   : > { %8844 = vmatprep.subr.bf16.mxu0 %v9237_v3  ;;  %8880 = vmatprep.subr.bf16.mxu1 %v9237_v3 }
  0x57   : > { %8283 = vmatmul.mubr.f32.vlgmr.msra.gmra.mrb[2].mxu0 %v9439_v62  ;;  %8349 = vmatmul.mubr.f32.vlgmr.msra.gmra.mrb[2].mxu1 %v9439_v62  ;;  %v8887_v62 = vpack.c.bf16 %v9537_v32, %v9535_v30 }
  0x58   : > { %8846 = vmatpush3.bf16.msra.mxu0 %v8845_v1  ;;  %8882 = vmatpush3.bf16.msra.mxu1 %v8881_v2 }
  0x59   : > { %8847 = vmatprep.subr.bf16.mxu0 %v9237_v3  ;;  %8883 = vmatprep.subr.bf16.mxu1 %v9237_v3 }
  0x5a   : > { %8293 = vmatprep.mubr.msk.f32.mxu0 %vm9238_vm0, %v9239_v15  ;;  %8359 = vmatprep.mubr.msk.f32.mxu1 %vm9238_vm0, %v9239_v15 }
  0x5c   : > { %8849 = vmatpush3.bf16.msra.mxu0 %v8848_v6  ;;  %8885 = vmatpush3.bf16.msra.mxu1 %v8884_v7 }
  0x5d   : > { %8850 = vmatprep.subr.bf16.mxu0 %v9237_v3  ;;  %8886 = vmatprep.subr.bf16.mxu1 %v9237_v3 }
  0x5f   : > { %8294 = vmatmul.mubr.f32.vlgmr.msra.gmra.mrb[2].mxu0 %v9415_v43  ;;  %8360 = vmatmul.mubr.f32.vlgmr.msra.gmra.mrb[2].mxu1 %v9415_v43 }
  0x60   : > { %8852 = vmatpush3.bf16.msra.mxu0 %v8851_v8  ;;  %8888 = vmatpush3.bf16.msra.mxu1 %v8887_v62 }
  0x61   : > { %8853 = vmatprep.subr.bf16.mxu0 %v9237_v3  ;;  %8889 = vmatprep.subr.bf16.mxu1 %v9237_v3 }
  0x62   : > { %8304 = vmatprep.mubr.msk.f32.mxu0 %vm9238_vm0, %v9239_v15  ;;  %8370 = vmatprep.mubr.msk.f32.mxu1 %vm9238_vm0, %v9239_v15 }
  0x64   : > { %8855 = vmatpush3.bf16.msra.mxu0 %v8854_v9  ;;  %8891 = vmatpush3.bf16.msra.mxu1 %v8890_v10 }
  0x65   : > { %8856 = vmatprep.subr.bf16.mxu0 %v9237_v3  ;;  %8892 = vmatprep.subr.bf16.mxu1 %v9237_v3 }
  0x67   : > { %8305 = vmatmul.mubr.f32.vlgmr.msra.gmra.mrb[2].mxu0 %v9422_v45  ;;  %8371 = vmatmul.mubr.f32.vlgmr.msra.gmra.mrb[2].mxu1 %v9422_v45  ;;  %v8863_v45 = vpack.c.bf16 %v1366_v38, %v1359_v37 }
  0x68   : > { %8858 = vmatpush3.bf16.msra.mxu0 %v9563_v16  ;;  %8894 = vmatpush3.bf16.msra.mxu1 %v9565_v20 }
  0x69   : > { %8859 = vmatprep.subr.bf16.mxu0 %v9237_v3  ;;  %8895 = vmatprep.subr.bf16.mxu1 %v9237_v3 }
  0x6a   : > { %8315 = vmatprep.mubr.msk.f32.mxu0 %vm9238_vm0, %v9239_v15  ;;  %8381 = vmatprep.mubr.msk.f32.mxu1 %vm9238_vm0, %v9239_v15 }
  0x6c   : > { %8861 = vmatpush3.bf16.msra.mxu0 %v9587_v54  ;;  %8897 = vmatpush3.bf16.msra.mxu1 %v9589_v22 }
  0x6d   : > { %8862 = vmatprep.subr.bf16.mxu0 %v9237_v3  ;;  %8898 = vmatprep.subr.bf16.mxu1 %v9237_v3 }
  0x6f   : > { %8316 = vmatmul.mubr.f32.vlgmr.msra.gmra.mrb[2].mxu0 %v9432_v53  ;;  %8382 = vmatmul.mubr.f32.vlgmr.msra.gmra.mrb[2].mxu1 %v9432_v53 }
  0x70   : > { %8864 = vmatpush3.bf16.msra.mxu0 %v8863_v45  ;;  %8900 = vmatpush3.bf16.msra.mxu1 %v8899_v11 }
  0x71   : > { %8865 = vmatprep.subr.bf16.mxu0 %v9237_v3  ;;  %8901 = vmatprep.subr.bf16.mxu1 %v9237_v3 }
  0x72   : > { %8326 = vmatprep.mubr.msk.f32.mxu0 %vm9238_vm0, %v9239_v15  ;;  %8392 = vmatprep.mubr.msk.f32.mxu1 %vm9238_vm0, %v9239_v15 }
  0x74   : > { %8867 = vmatpush3.bf16.msra.mxu0 %v8866_v12  ;;  %8903 = vmatpush3.bf16.msra.mxu1 %v8902_v13 }
  0x75   : > { %8868 = vmatprep.subr.bf16.mxu0 %v9237_v3  ;;  %8904 = vmatprep.subr.bf16.mxu1 %v9237_v3 }
  0x77   : > { %8327 = vmatmul.mubr.f32.vlgmr.msra.gmra.mrb[2].mxu0 %v9415_v43  ;;  %8393 = vmatmul.mubr.f32.vlgmr.msra.gmra.mrb[2].mxu1 %v9415_v43 }
  0x78   : > { %8870 = vmatpush3.bf16.msra.mxu0 %v9563_v16  ;;  %8906 = vmatpush3.bf16.msra.mxu1 %v9565_v20 }
  0x79   : > { %8871 = vmatprep.subr.bf16.mxu0 %v9237_v3  ;;  %8907 = vmatprep.subr.bf16.mxu1 %v9237_v3  ;;  %v7865_v3 = vld [vmem:[%s10192_s2] ss:$0 sm:$0xff] }
  0x7a   : > { %8337 = vmatprep.mubr.msk.f32.mxu0 %vm9238_vm0, %v9239_v15  ;;  %8403 = vmatprep.mubr.msk.f32.mxu1 %vm9238_vm0, %v9239_v15 }
  0x7c   : > { %8873 = vmatpush3.bf16.msra.mxu0 %v9587_v54  ;;  %8909 = vmatpush3.bf16.msra.mxu1 %v9589_v22 }
  0x7d   : > { %8406 = vmatprep.subr.mxu0 %v9239_v15  ;;  %8436 = vmatprep.subr.mxu1 %v9239_v15 }
  0x7f   : > { %8338 = vmatmul.mubr.f32.vlgmr.msra.gmra.mrb[2].mxu0 %v9415_v43  ;;  %8404 = vmatmul.mubr.f32.vlgmr.msra.gmra.mrb[2].mxu1 %v9415_v43  ;;  %v7866_v43 = vld [vmem:[%s10192_s2 + $0x1] ss:$0 sm:$0xff] }
  0x80   : > { %8408 = vmatprep.mubr.msk.f32.mxu0 %vm9238_vm0, %v9239_v15  ;;  %8438 = vmatprep.mubr.msk.f32.mxu1 %vm9238_vm0, %v9239_v15 }
 0x122   : > { %v788_v53 = vpop.f32.mrb[0].mxu0  ;;  %v1273_v14 = vpop.f32.mrb[0].mxu1 }
 0x123   : > { %v9708_v17 = vadd.f32 %v7865_v3, %v788_v53  ;;  %v8207_v18 = vpop.f32.mrb[1].mxu0  ;;  %v8273_v19 = vpop.f32.mrb[1].mxu1  ;;  %v9714_v21 = vadd.f32 %v7866_v43, %v1273_v14 }
 0x125   : > { %2248 = vrot.lane.b32.xlu0 %v9708_v17, %s9240_s20  ;;  %v2251_v32 = vsel %vm2250_vm2, %v9708_v17, 0  ;;  %v2704_v34 = vsel %vm2250_vm2, %v9714_v21, 0 }
 0x126   : > { %v9731_v33 = vand.u32 4294901760, %v2251_v32  ;;  %v9736_v36 = vand.u32 4294901760, %v2704_v34 }
 0x128   : > { %v2322_v35 = vsub.f32 %v2251_v32, %v9731_v33  ;;  %v2775_v37 = vsub.f32 %v2704_v34, %v9736_v36 }
 0x129   : > { %2702 = vrot.lane.b32.xlu0 %v9714_v21, %s9240_s20 }
 0x12a   : > { %v2323_v38 = vand.u32 4294901760, %v2322_v35  ;;  %v2776_v42 = vand.u32 4294901760, %v2775_v37 }
 0x12c   : > { %v2324_v41 = vsub.f32 %v2322_v35, %v2323_v38  ;;  %v2777_v48 = vsub.f32 %v2775_v37, %v2776_v42 }
 0x12e   : > { %v2325_v47 = vand.u32 4294901760, %v2324_v41  ;;  %v2778_v54 = vand.u32 4294901760, %v2777_v48 }
 0x152   : > { %v1758_v23 = vpop.f32.mrb[2].mxu0  ;;  %v2243_v24 = vpop.f32.mrb[2].mxu1 }
 0x153   : > { %v9720_v26 = vadd.f32 %v7867_v25, %v1758_v23  ;;  %v8339_v27 = vpop.f32.mrb[3].mxu0  ;;  %v8405_v28 = vpop.f32.mrb[3].mxu1  ;;  %v9726_v30 = vadd.f32 %v7868_v29, %v2243_v24 }
 0x155   : > { %3155 = vrot.lane.b32.xlu1 %v9720_v26, %s9240_s20  ;;  %v3157_v57 = vsel %vm2250_vm2, %v9720_v26, 0  ;;  %v3610_v59 = vsel %vm2250_vm2, %v9726_v30, 0 }
 0x156   : > { %v9770_v58 = vand.u32 4294901760, %v3157_v57  ;;  %v9779_v61 = vand.u32 4294901760, %v3610_v59 }
 0x158   : > { %v3228_v60 = vsub.f32 %v3157_v57, %v9770_v58  ;;  %v3681_v63 = vsub.f32 %v3610_v59, %v9779_v61 }
 0x159   : > { %3608 = vrot.lane.b32.xlu1 %v9726_v30, %s9240_s20 }
 0x15a   : > { %v3229_v0 = vand.u32 4294901760, %v3228_v60  ;;  %v3682_v5 = vand.u32 4294901760, %v3681_v63 }
 0x15c   : > { %v3230_v4 = vsub.f32 %v3228_v60, %v3229_v0  ;;  %v3683_v10 = vsub.f32 %v3681_v63, %v3682_v5 }
 0x15e   : > { %v3231_v9 = vand.u32 4294901760, %v3230_v4  ;;  %v3684_v3 = vand.u32 4294901760, %v3683_v10 }
 0x197   : > { %v2249_v39 = vpop.permute.xlu0 %2248 }
 0x198   : > { %v2253_v40 = vsel %vm2250_vm2, %v2249_v39, 0 }
 0x199   : > { %v2256_v16 = vand.u32 4294901760, %v2253_v40 }
 0x19b   : > { %v2333_v20 = vsub.f32 %v2253_v40, %v2256_v16  ;;  %8407 = vmatpush3.xpose.msra.mxu0 %v2256_v16  ;;  %v2703_v44 = vpop.permute.xlu0 %2702 }
 0x19c   : > { %v2706_v46 = vsel %vm2250_vm2, %v2703_v44, 0  ;;  %8411 = vmatprep.subr.mxu0 %v9239_v15 }
 0x19d   : > { %v2334_v49 = vand.u32 4294901760, %v2333_v20  ;;  %v2709_v50 = vand.u32 4294901760, %v2706_v46 }
 0x19e   : > { %8409 = vmatmul.mubr.f32.vlgmr.msra.gmra.mrb[4].mxu0 %v2325_v47 }
 0x19f   : > { %v2335_v51 = vsub.f32 %v2333_v20, %v2334_v49  ;;  %v2786_v52 = vsub.f32 %v2706_v46, %v2709_v50  ;;  %8437 = vmatpush3.xpose.msra.mxu1 %v2709_v50  ;;  %8413 = vmatprep.mubr.msk.f32.mxu0 %vm9238_vm0, %v9239_v15 }
 0x1a0   : > { %8441 = vmatprep.subr.mxu1 %v9239_v15 }
 0x1a1   : > { %v2336_v22 = vand.u32 4294901760, %v2335_v51  ;;  %v2787_v31 = vand.u32 4294901760, %v2786_v52 }
 0x1a2   : > { %8439 = vmatmul.mubr.f32.vlgmr.msra.gmra.mrb[4].mxu1 %v2778_v54 }
 0x1a3   : > { %v2788_v55 = vsub.f32 %v2786_v52, %v2787_v31  ;;  %8412 = vmatpush3.xpose.msra.mxu0 %v2336_v22  ;;  %8443 = vmatprep.mubr.msk.f32.mxu1 %vm9238_vm0, %v9239_v15 }
 0x1a4   : > { %8416 = vmatprep.subr.mxu0 %v9239_v15 }
 0x1a5   : > { %v2789_v56 = vand.u32 4294901760, %v2788_v55 }
 0x1a6   : > { %8414 = vmatmul.mubr.f32.vlgmr.msra.gmra.mrb[4].mxu0 %v9731_v33 }
 0x1a7   : > { %8417 = vmatpush3.xpose.msra.mxu0 %v2333_v20  ;;  %8442 = vmatpush3.xpose.msra.mxu1 %v2789_v56 }
 0x1a8   : > { %8446 = vmatprep.subr.mxu1 %v9239_v15  ;;  %8418 = vmatprep.mubr.msk.f32.mxu0 %vm9238_vm0, %v9239_v15 }
 0x1a9   : > { %8421 = vmatprep.subr.mxu0 %v9239_v15 }
 0x1aa   : > { %8444 = vmatmul.mubr.f32.vlgmr.msra.gmra.mrb[4].mxu1 %v9736_v36 }
 0x1ab   : > { %8447 = vmatpush3.xpose.msra.mxu1 %v2786_v52  ;;  %8448 = vmatprep.mubr.msk.f32.mxu1 %vm9238_vm0, %v9239_v15 }
 0x1ac   : > { %8451 = vmatprep.subr.mxu1 %v9239_v15 }
 0x1ae   : > { %8419 = vmatmul.mubr.f32.vlgmr.msra.gmra.mrb[4].mxu0 %v2322_v35 }
 0x1af   : > { %8422 = vmatpush3.xpose.msra.mxu0 %v2256_v16  ;;  %8423 = vmatprep.mubr.msk.f32.mxu0 %vm9238_vm0, %v9239_v15 }
 0x1b0   : > { %8426 = vmatprep.subr.mxu0 %v9239_v15 }
 0x1b2   : > { %8449 = vmatmul.mubr.f32.vlgmr.msra.gmra.mrb[4].mxu1 %v2775_v37 }
 0x1b3   : > { %8452 = vmatpush3.xpose.msra.mxu1 %v2709_v50  ;;  %8453 = vmatprep.mubr.msk.f32.mxu1 %vm9238_vm0, %v9239_v15 }
 0x1b4   : > { %8456 = vmatprep.subr.mxu1 %v9239_v15 }
 0x1b6   : > { %8424 = vmatmul.mubr.f32.vlgmr.msra.gmra.mrb[4].mxu0 %v2323_v38 }
 0x1b7   : > { %8427 = vmatpush3.xpose.msra.mxu0 %v2334_v49  ;;  %8428 = vmatprep.mubr.msk.f32.mxu0 %vm9238_vm0, %v9239_v15 }
 0x1b8   : > { %8431 = vmatprep.subr.mxu0 %v9239_v15 }
 0x1ba   : > { %8454 = vmatmul.mubr.f32.vlgmr.msra.gmra.mrb[4].mxu1 %v2776_v42 }
 0x1bb   : > { %8457 = vmatpush3.xpose.msra.mxu1 %v2787_v31  ;;  %8458 = vmatprep.mubr.msk.f32.mxu1 %vm9238_vm0, %v9239_v15 }
 0x1bc   : > { %8461 = vmatprep.subr.mxu1 %v9239_v15 }
 0x1be   : > { %8429 = vmatmul.mubr.f32.vlgmr.msra.gmra.mrb[4].mxu0 %v9731_v33 }
 0x1bf   : > { %8432 = vmatpush3.xpose.msra.mxu0 %v2256_v16  ;;  %8433 = vmatprep.mubr.msk.f32.mxu0 %vm9238_vm0, %v9239_v15 }
 0x1c0   : > { %8466 = vmatprep.subr.mxu0 %v9239_v15 }
 0x1c2   : > { %8459 = vmatmul.mubr.f32.vlgmr.msra.gmra.mrb[4].mxu1 %v9736_v36 }
 0x1c3   : > { %8462 = vmatpush3.xpose.msra.mxu1 %v2709_v50  ;;  %8463 = vmatprep.mubr.msk.f32.mxu1 %vm9238_vm0, %v9239_v15 }
 0x1c4   : > { %8496 = vmatprep.subr.mxu1 %v9239_v15 }
 0x1c6   : > { %8434 = vmatmul.mubr.f32.vlgmr.msra.gmra.mrb[4].mxu0 %v9731_v33 }
 0x1c7   : > { %v3156_v1 = vpop.permute.xlu1 %3155  ;;  %8468 = vmatprep.mubr.msk.f32.mxu0 %vm9238_vm0, %v9239_v15 }
 0x1c8   : > { %v3159_v2 = vsel %vm2250_vm2, %v3156_v1, 0 }
 0x1c9   : > { %v3162_v6 = vand.u32 4294901760, %v3159_v2 }
 0x1ca   : > { %8464 = vmatmul.mubr.f32.vlgmr.msra.gmra.mrb[4].mxu1 %v9736_v36 }
 0x1cb   : > { %v3239_v7 = vsub.f32 %v3159_v2, %v3162_v6  ;;  %8467 = vmatpush3.xpose.msra.mxu0 %v3162_v6  ;;  %v3609_v8 = vpop.permute.xlu1 %3608  ;;  %8498 = vmatprep.mubr.msk.f32.mxu1 %vm9238_vm0, %v9239_v15 }
 0x1cc   : > { %v3612_v62 = vsel %vm2250_vm2, %v3609_v8, 0  ;;  %8471 = vmatprep.subr.mxu0 %v9239_v15 }
 0x1cd   : > { %v3240_v45 = vand.u32 4294901760, %v3239_v7  ;;  %v3615_v11 = vand.u32 4294901760, %v3612_v62 }
 0x1ce   : > { %8469 = vmatmul.mubr.f32.vlgmr.msra.gmra.mrb[6].mxu0 %v3231_v9 }
 0x1cf   : > { %v3241_v12 = vsub.f32 %v3239_v7, %v3240_v45  ;;  %v3692_v13 = vsub.f32 %v3612_v62, %v3615_v11  ;;  %8497 = vmatpush3.xpose.msra.mxu1 %v3615_v11  ;;  %8473 = vmatprep.mubr.msk.f32.mxu0 %vm9238_vm0, %v9239_v15 }
 0x1d0   : > { %8501 = vmatprep.subr.mxu1 %v9239_v15 }
 0x1d1   : > { %v3242_v53 = vand.u32 4294901760, %v3241_v12  ;;  %v3693_v14 = vand.u32 4294901760, %v3692_v13 }
 0x1d2   : > { %8499 = vmatmul.mubr.f32.vlgmr.msra.gmra.mrb[6].mxu1 %v3684_v3 }
 0x1d3   : > { %v3694_v18 = vsub.f32 %v3692_v13, %v3693_v14  ;;  %8472 = vmatpush3.xpose.msra.mxu0 %v3242_v53  ;;  %8503 = vmatprep.mubr.msk.f32.mxu1 %vm9238_vm0, %v9239_v15 }
 0x1d4   : > { %8476 = vmatprep.subr.mxu0 %v9239_v15 }
 0x1d5   : > { %v3695_v19 = vand.u32 4294901760, %v3694_v18 }
 0x1d6   : > { %8474 = vmatmul.mubr.f32.vlgmr.msra.gmra.mrb[6].mxu0 %v9770_v58 }
 0x1d7   : > { %8477 = vmatpush3.xpose.msra.mxu0 %v3239_v7  ;;  %8502 = vmatpush3.xpose.msra.mxu1 %v3695_v19 }
 0x1d8   : > { %8506 = vmatprep.subr.mxu1 %v9239_v15  ;;  %8478 = vmatprep.mubr.msk.f32.mxu0 %vm9238_vm0, %v9239_v15 }
 0x1d9   : > { %8481 = vmatprep.subr.mxu0 %v9239_v15 }
 0x1da   : > { %8504 = vmatmul.mubr.f32.vlgmr.msra.gmra.mrb[6].mxu1 %v9779_v61 }
 0x1db   : > { %8507 = vmatpush3.xpose.msra.mxu1 %v3692_v13  ;;  %8508 = vmatprep.mubr.msk.f32.mxu1 %vm9238_vm0, %v9239_v15 }
 0x1dc   : > { %8511 = vmatprep.subr.mxu1 %v9239_v15 }
 0x1de   : > { %8479 = vmatmul.mubr.f32.vlgmr.msra.gmra.mrb[6].mxu0 %v3228_v60 }
 0x1df   : > { %8482 = vmatpush3.xpose.msra.mxu0 %v3162_v6  ;;  %8483 = vmatprep.mubr.msk.f32.mxu0 %vm9238_vm0, %v9239_v15 }
 0x1e0   : > { %8486 = vmatprep.subr.mxu0 %v9239_v15 }
 0x1e2   : > { %8509 = vmatmul.mubr.f32.vlgmr.msra.gmra.mrb[6].mxu1 %v3681_v63 }
 0x1e3   : > { %8512 = vmatpush3.xpose.msra.mxu1 %v3615_v11  ;;  %8513 = vmatprep.mubr.msk.f32.mxu1 %vm9238_vm0, %v9239_v15 }
 0x1e4   : > { %8516 = vmatprep.subr.mxu1 %v9239_v15 }
 0x1e6   : > { %8484 = vmatmul.mubr.f32.vlgmr.msra.gmra.mrb[6].mxu0 %v3229_v0 }
 0x1e7   : > { %8487 = vmatpush3.xpose.msra.mxu0 %v3240_v45  ;;  %8488 = vmatprep.mubr.msk.f32.mxu0 %vm9238_vm0, %v9239_v15 }
 0x1e8   : > { %8491 = vmatprep.subr.mxu0 %v9239_v15 }
 0x1ea   : > { %8514 = vmatmul.mubr.f32.vlgmr.msra.gmra.mrb[6].mxu1 %v3682_v5 }
 0x1eb   : > { %8517 = vmatpush3.xpose.msra.mxu1 %v3693_v14  ;;  %8518 = vmatprep.mubr.msk.f32.mxu1 %vm9238_vm0, %v9239_v15 }
 0x1ec   : > { %8521 = vmatprep.subr.mxu1 %v9239_v15 }
 0x1ee   : > { %8489 = vmatmul.mubr.f32.vlgmr.msra.gmra.mrb[6].mxu0 %v9770_v58 }
 0x1ef   : > { %8492 = vmatpush3.xpose.msra.mxu0 %v3162_v6  ;;  %8493 = vmatprep.mubr.msk.f32.mxu0 %vm9238_vm0, %v9239_v15 }
 0x1f0   : > { %8526 = vmatprep.subr.mxu0 %v9239_v15 }
 0x1f2   : > { %8519 = vmatmul.mubr.f32.vlgmr.msra.gmra.mrb[6].mxu1 %v9779_v61 }
 0x1f3   : > { %8522 = vmatpush3.xpose.msra.mxu1 %v3615_v11  ;;  %8523 = vmatprep.mubr.msk.f32.mxu1 %vm9238_vm0, %v9239_v15 }
 0x1f4   : > { %8556 = vmatprep.subr.mxu1 %v9239_v15 }
 0x1f6   : > { %8494 = vmatmul.mubr.f32.vlgmr.msra.gmra.mrb[6].mxu0 %v9770_v58 }
 0x1f7   : > { %8528 = vmatprep.mubr.msk.f32.mxu0 %vm9238_vm0, %v9239_v15 }
 0x1fa   : > { %8524 = vmatmul.mubr.f32.vlgmr.msra.gmra.mrb[6].mxu1 %v9779_v61 }
 0x1fb   : > { %8558 = vmatprep.mubr.msk.f32.mxu1 %vm9238_vm0, %v9239_v15 }
 0x299   : > { %v2697_v43 = vpop.f32.mrb[4].mxu0 }
 0x29a   : > { %v8435_v25 = vpop.f32.mrb[5].mxu0  ;;  %v4060_v23 = vsel %vm2250_vm2, %v2697_v43, -inf }
 0x29b   : > { %4061 = vmax.xlane.f32.xlu0 %v4060_v23 }
 0x29d   : > { %v3150_v24 = vpop.f32.mrb[4].mxu1 }
 0x29e   : > { %v8465_v27 = vpop.f32.mrb[5].mxu1  ;;  %v4063_v28 = vsel %vm2250_vm2, %v3150_v24, -inf }
 0x29f   : > { %4064 = vmax.xlane.f32.xlu1 %v4063_v28 }
 0x2c9   : > { %v3603_v29 = vpop.f32.mrb[6].mxu0 }
 0x2ca   : > { %v8495_v32 = vpop.f32.mrb[7].mxu0  ;;  %v4066_v33 = vsel %vm2250_vm2, %v3603_v29, -inf }
 0x2cb   : > { %4067 = vmax.xlane.f32.xlu0 %v4066_v33 }
 0x2cd   : > { %v4056_v34 = vpop.f32.mrb[6].mxu1 }
 0x2ce   : > { %v8525_v35 = vpop.f32.mrb[7].mxu1  ;;  %v4069_v36 = vsel %vm2250_vm2, %v4056_v34, -inf }
 0x2cf   : > { %4070 = vmax.xlane.f32.xlu0 %v4069_v36 }
 0x328   : > { %v4062_v37 = vpop.xlane.xlu0 %4061 }
 0x329   : > { %v4072_v38 = vsub.f32 %v2697_v43, %v4062_v37 }
 0x32b   : > { %v4076_v39 = vmul.f32 1.442695, %v4072_v38 }
 0x32c   : > { %v4065_v40 = vpop.xlane.xlu1 %4064 }
 0x32d   : > { %9125 = vpow2.f32 %v4076_v39  ;;  %v4073_v41 = vsub.f32 %v3150_v24, %v4065_v40 }
 0x32f   : > { %v4078_v42 = vmul.f32 1.442695, %v4073_v41 }
 0x331   : > { %9127 = vpow2.f32 %v4078_v42 }
 0x337   : > { %v9126_v16 = vpop.eup %9125 }
 0x338   : > { %v4084_v20 = vsel %vm2250_vm2, %v9126_v16, 0.0 }
 0x339   : > { %4085 = vadd.xlane.f32.xlu1 %v4084_v20 }
 0x33b   : > { %v9128_v44 = vpop.eup %9127 }
 0x33c   : > { %v4087_v46 = vsel %vm2250_vm2, %v9128_v44, 0.0 }
 0x33d   : > { %4088 = vadd.xlane.f32.xlu0 %v4087_v46 }
 0x34a   : > { %4108 = vrot.lane.b32.xlu1 %v9708_v17, %s9241_s10 }
 0x353   : > { %4560 = vrot.lane.b32.xlu0 %v9714_v21, %s9241_s10 }
 0x358   : > { %v4068_v47 = vpop.xlane.xlu0 %4067 }
 0x359   : > { %v4074_v48 = vsub.f32 %v3603_v29, %v4068_v47 }
 0x35b   : > { %v4080_v49 = vmul.f32 1.442695, %v4074_v48 }
 0x35c   : > { %v4071_v50 = vpop.xlane.xlu0 %4070 }
 0x35d   : > { %v4075_v51 = vsub.f32 %v4056_v34, %v4071_v50  ;;  %9129 = vpow2.f32 %v4080_v49 }
 0x35f   : > { %v4082_v52 = vmul.f32 1.442695, %v4075_v51 }
 0x361   : > { %9131 = vpow2.f32 %v4082_v52 }
 0x367   : > { %v9845_v54 = vpop.eup %9129 }
 0x368   : > { %v4090_v22 = vsel %vm2250_vm2, %v9845_v54, 0.0 }
 0x36b   : > { %v9849_v31 = vpop.eup %9131 }
 0x36c   : > { %v4093_v17 = vsel %vm2250_vm2, %v9849_v31, 0.0 }
 0x36e   : > { %4091 = vadd.xlane.f32.xlu1 %v4090_v22  ;;  %v5916_v22 = vld [vmem:[%s10193_s3] sm:$0xff] }
 0x372   : > { %4094 = vadd.xlane.f32.xlu0 %v4093_v17  ;;  %v5917_v17 = vld [vmem:[%s10193_s3 + $0x8] sm:$0xff] }
 0x37f   : > { %5012 = vrot.lane.b32.xlu1 %v9720_v26, %s9241_s10 }
 0x388   : > { %5464 = vrot.lane.b32.xlu0 %v9726_v30, %s9241_s10 }
 0x3c6   : > { %v4086_v21 = vpop.xlane.xlu1 %4085 }
 0x3c7   : > { %9133 = vrcp.f32 %v4086_v21  ;;  %v9999_v21 = vand.u32 4294901760, %v5917_v17 }
 0x3ca   : > { %v4109_v55 = vpop.permute.xlu1 %4108  ;;  %v4089_v56 = vpop.xlane.xlu0 %4088 }
 0x3cb   : > { %v9855_v57 = vand.u32 4294901760, %v4109_v55  ;;  %9135 = vrcp.f32 %v4089_v56 }
 0x3cd   : > { %8527 = vmatpush3.msra.mxu0 %v9855_v57  ;;  %v4192_v60 = vsub.f32 %v4109_v55, %v9855_v57 }
 0x3ce   : > { %v4561_v58 = vpop.permute.xlu0 %4560  ;;  %8531 = vmatprep.subr.mxu0 %v9239_v15 }
 0x3cf   : > { %v9863_v59 = vand.u32 4294901760, %v4561_v58  ;;  %v4193_v1 = vand.u32 4294901760, %v4192_v60 }
 0x3d1   : > { %v9134_v26 = vpop.eup %9133  ;;  %8557 = vmatpush3.msra.mxu1 %v9863_v59  ;;  %v4644_v4 = vsub.f32 %v4561_v58, %v9863_v59  ;;  %v4194_v62 = vsub.f32 %v4192_v60, %v4193_v1 }
 0x3d2   : > { %v4097_v30 = vmul.f32 %v9134_v26, %v9126_v16  ;;  %8561 = vmatprep.subr.mxu1 %v9239_v15 }
 0x3d3   : > { %v4645_v9 = vand.u32 4294901760, %v4644_v4  ;;  %v4195_v13 = vand.u32 4294901760, %v4194_v62 }
 0x3d4   : > { %v4112_v61 = vsel %vm2250_vm2, %v4097_v30, 0  ;;  %4104 = vst.msk [vmem:[%s9869_s13] sm:$0xff] %vm2250_vm2, %v4097_v30 }
 0x3d5   : > { %v9136_v63 = vpop.eup %9135  ;;  %v9873_v0 = vand.u32 4294901760, %v4112_v61  ;;  %v4646_v3 = vsub.f32 %v4644_v4, %v4645_v9 }
 0x3d6   : > { %v4099_v2 = vmul.f32 %v9136_v63, %v9128_v44 }
 0x3d7   : > { %v4181_v5 = vsub.f32 %v4112_v61, %v9873_v0  ;;  %v4647_v18 = vand.u32 4294901760, %v4646_v3 }
 0x3d8   : > { %v4564_v6 = vsel %vm2250_vm2, %v4099_v2, 0  ;;  %4105 = vst.msk [vmem:[%s9869_s13 + $0x8] sm:$0xff] %vm2250_vm2, %v4099_v2 }
 0x3d9   : > { %v4182_v7 = vand.u32 4294901760, %v4181_v5  ;;  %v9880_v8 = vand.u32 4294901760, %v4564_v6 }
 0x3db   : > { %v4183_v10 = vsub.f32 %v4181_v5, %v4182_v7  ;;  %v4633_v45 = vsub.f32 %v4564_v6, %v9880_v8 }
 0x3dd   : > { %v4184_v11 = vand.u32 4294901760, %v4183_v10  ;;  %v4634_v12 = vand.u32 4294901760, %v4633_v45 }
 0x3df   : > { %8529 = vmatmul.mubr.f32.vlgmr.msra.gmra.mrb[8].mxu0 %v4184_v11  ;;  %v4635_v53 = vsub.f32 %v4633_v45, %v4634_v12 }
 0x3e0   : > { %8532 = vmatpush3.msra.mxu0 %v4195_v13  ;;  %8533 = vmatprep.mubr.msk.f32.mxu0 %vm9238_vm0, %v9239_v15  ;;  %v5918_v13 = vld [vmem:[%s10193_s3 + $0x10] sm:$0xff] }
 0x3e1   : > { %v4636_v14 = vand.u32 4294901760, %v4635_v53  ;;  %8536 = vmatprep.subr.mxu0 %v9239_v15  ;;  %v10044_v3 = vand.u32 4294901760, %v5918_v13  ;;  %v5919_v53 = vld [vmem:[%s10193_s3 + $0x18] sm:$0xff] }
 0x3e3   : > { %8559 = vmatmul.mubr.f32.vlgmr.msra.gmra.mrb[8].mxu1 %v4636_v14  ;;  %v6899_v14 = vsub.f32 %v5918_v13, %v10044_v3 }
 0x3e4   : > { %8562 = vmatpush3.msra.mxu1 %v4647_v18  ;;  %8563 = vmatprep.mubr.msk.f32.mxu1 %vm9238_vm0, %v9239_v15  ;;  %v10055_v18 = vand.u32 4294901760, %v5919_v53 }
 0x3e5   : > { %8566 = vmatprep.subr.mxu1 %v9239_v15 }
 0x3e7   : > { %8534 = vmatmul.mubr.f32.vlgmr.msra.gmra.mrb[8].mxu0 %v9873_v0 }
 0x3e8   : > { %8537 = vmatpush3.msra.mxu0 %v4192_v60  ;;  %8538 = vmatprep.mubr.msk.f32.mxu0 %vm9238_vm0, %v9239_v15 }
 0x3e9   : > { %8541 = vmatprep.subr.mxu0 %v9239_v15 }
 0x3eb   : > { %8564 = vmatmul.mubr.f32.vlgmr.msra.gmra.mrb[8].mxu1 %v9880_v8 }
 0x3ec   : > { %8567 = vmatpush3.msra.mxu1 %v4644_v4  ;;  %8568 = vmatprep.mubr.msk.f32.mxu1 %vm9238_vm0, %v9239_v15 }
 0x3ed   : > { %8571 = vmatprep.subr.mxu1 %v9239_v15 }
 0x3ef   : > { %8539 = vmatmul.mubr.f32.vlgmr.msra.gmra.mrb[8].mxu0 %v4181_v5 }
 0x3f0   : > { %8542 = vmatpush3.msra.mxu0 %v9855_v57  ;;  %8543 = vmatprep.mubr.msk.f32.mxu0 %vm9238_vm0, %v9239_v15 }
 0x3f1   : > { %8546 = vmatprep.subr.mxu0 %v9239_v15 }
 0x3f3   : > { %8569 = vmatmul.mubr.f32.vlgmr.msra.gmra.mrb[8].mxu1 %v4633_v45 }
 0x3f4   : > { %8572 = vmatpush3.msra.mxu1 %v9863_v59  ;;  %8573 = vmatprep.mubr.msk.f32.mxu1 %vm9238_vm0, %v9239_v15 }
 0x3f5   : > { %8576 = vmatprep.subr.mxu1 %v9239_v15 }
 0x3f7   : > { %8544 = vmatmul.mubr.f32.vlgmr.msra.gmra.mrb[8].mxu0 %v4182_v7 }
 0x3f8   : > { %8547 = vmatpush3.msra.mxu0 %v4193_v1  ;;  %8548 = vmatprep.mubr.msk.f32.mxu0 %vm9238_vm0, %v9239_v15 }
 0x3f9   : > { %8551 = vmatprep.subr.mxu0 %v9239_v15 }
 0x3fb   : > { %v4092_v19 = vpop.xlane.xlu1 %4091  ;;  %8574 = vmatmul.mubr.f32.vlgmr.msra.gmra.mrb[8].mxu1 %v4634_v12 }
 0x3fc   : > { %9137 = vrcp.f32 %v4092_v19  ;;  %8577 = vmatpush3.msra.mxu1 %v4645_v9  ;;  %8578 = vmatprep.mubr.msk.f32.mxu1 %vm9238_vm0, %v9239_v15 }
 0x3fd   : > { %8581 = vmatprep.subr.mxu1 %v9239_v15 }
 0x3ff   : > { %8549 = vmatmul.mubr.f32.vlgmr.msra.gmra.mrb[8].mxu0 %v9873_v0  ;;  %v4095_v43 = vpop.xlane.xlu0 %4094  ;;  %v5013_v25 = vpop.permute.xlu1 %5012 }
 0x400   : > { %8552 = vmatpush3.msra.mxu0 %v9855_v57  ;;  %9139 = vrcp.f32 %v4095_v43  ;;  %8553 = vmatprep.mubr.msk.f32.mxu0 %vm9238_vm0, %v9239_v15  ;;  %v9916_v23 = vand.u32 4294901760, %v5013_v25 }
 0x401   : > { %8586 = vmatprep.subr.mxu0 %v9239_v15 }
 0x402   : > { %v5096_v29 = vsub.f32 %v5013_v25, %v9916_v23 }
 0x403   : > { %8579 = vmatmul.mubr.f32.vlgmr.msra.gmra.mrb[8].mxu1 %v9880_v8  ;;  %v5465_v24 = vpop.permute.xlu0 %5464 }
 0x404   : > { %8582 = vmatpush3.msra.mxu1 %v9863_v59  ;;  %8583 = vmatprep.mubr.msk.f32.mxu1 %vm9238_vm0, %v9239_v15  ;;  %v9925_v32 = vand.u32 4294901760, %v5465_v24  ;;  %v5097_v36 = vand.u32 4294901760, %v5096_v29  ;;  %v6450_v59 = vsub.f32 %v5917_v17, %v9999_v21 }
 0x405   : > { %8616 = vmatprep.subr.mxu1 %v9239_v15 }
 0x406   : > { %v9138_v27 = vpop.eup %9137  ;;  %v5548_v38 = vsub.f32 %v5465_v24, %v9925_v32  ;;  %v5098_v16 = vsub.f32 %v5096_v29, %v5097_v36  ;;  %v6451_v2 = vand.u32 4294901760, %v6450_v59  ;;  %v6900_v24 = vand.u32 4294901760, %v6899_v14 }
 0x407   : > { %v4101_v28 = vmul.f32 %v9138_v27, %v9845_v54  ;;  %8554 = vmatmul.mubr.f32.vlgmr.msra.gmra.mrb[8].mxu0 %v9873_v0 }
 0x408   : > { %8587 = vmatpush3.msra.mxu0 %v9916_v23  ;;  %8588 = vmatprep.mubr.msk.f32.mxu0 %vm9238_vm0, %v9239_v15  ;;  %v5549_v20 = vand.u32 4294901760, %v5548_v38  ;;  %v5099_v49 = vand.u32 4294901760, %v5098_v16  ;;  %v6452_v62 = vsub.f32 %v6450_v59, %v6451_v2 }
 0x409   : > { %8591 = vmatprep.subr.mxu0 %v9239_v15  ;;  %v5016_v33 = vsel %vm2250_vm2, %v4101_v28, 0  ;;  %4106 = vst.msk [vmem:[%s9869_s13 + $0x10] sm:$0xff] %vm2250_vm2, %v4101_v28 }
 0x40a   : > { %v9140_v34 = vpop.eup %9139  ;;  %v9935_v35 = vand.u32 4294901760, %v5016_v33  ;;  %v5550_v50 = vsub.f32 %v5548_v38, %v5549_v20  ;;  %v6453_v11 = vand.u32 4294901760, %v6452_v62 }
 0x40b   : > { %v4103_v37 = vmul.f32 %v9140_v34, %v9849_v31  ;;  %8584 = vmatmul.mubr.f32.vlgmr.msra.gmra.mrb[8].mxu1 %v9880_v8  ;;  %v9992_v31 = vand.u32 4294901760, %v5916_v22  ;;  %v6901_v34 = vsub.f32 %v6899_v14, %v6900_v24 }
 0x40c   : > { %8617 = vmatpush3.msra.mxu1 %v9925_v32  ;;  %v5085_v39 = vsub.f32 %v5016_v33, %v9935_v35  ;;  %8618 = vmatprep.mubr.msk.f32.mxu1 %vm9238_vm0, %v9239_v15  ;;  %v5551_v54 = vand.u32 4294901760, %v5550_v50 }
 0x40d   : > { %8621 = vmatprep.subr.mxu1 %v9239_v15  ;;  %v5468_v40 = vsel %vm2250_vm2, %v4103_v37, 0  ;;  %4107 = vst.msk [vmem:[%s9869_s13 + $0x18] sm:$0xff] %vm2250_vm2, %v4103_v37  ;;  %v6001_v55 = vsub.f32 %v5916_v22, %v9992_v31  ;;  %s9147_s13 = scalar_lea.vmem %s9146_s17, 1024 }
 0x40e   : > { %v5086_v41 = vand.u32 4294901760, %v5085_v39  ;;  %v5536_v42 = vand.u32 4294901760, %v5468_v40  ;;  %p9149_p1 = scmp.lt.s32.totalorder %s9147_s13, %s9141_s15 }
 0x40f   : > { %v6002_v26 = vand.u32 4294901760, %v6001_v55 }
 0x410   : > { %v5087_v44 = vsub.f32 %v5085_v39, %v5086_v41  ;;  %v5537_v46 = vsub.f32 %v5468_v40, %v5536_v42  ;;  %v6902_v40 = vand.u32 4294901760, %v6901_v34  ;;  %p9150_p2 = por %p9149_p1, %p9148_p0 }
 0x411   : > { %v6003_v1 = vsub.f32 %v6001_v55, %v6002_v26 }
 0x412   : > { %v5088_v47 = vand.u32 4294901760, %v5087_v44  ;;  %v5538_v48 = vand.u32 4294901760, %v5537_v46  ;;  %p9151_p3 = pnand %p9150_p2, %p9144_p13 }
 0x413   : > { %v6004_v8 = vand.u32 4294901760, %v6003_v1 }
 0x414   : > { %8589 = vmatmul.mubr.f32.vlgmr.msra.gmra.mrb[10].mxu0 %v5088_v47  ;;  %v5539_v51 = vsub.f32 %v5537_v46, %v5538_v48 }
 0x415   : > { %8592 = vmatpush3.msra.mxu0 %v5099_v49  ;;  %8593 = vmatprep.mubr.msk.f32.mxu0 %vm9238_vm0, %v9239_v15 }
 0x416   : > { %v5540_v52 = vand.u32 4294901760, %v5539_v51  ;;  %8596 = vmatprep.subr.mxu0 %v9239_v15 }
 0x418   : > { %8619 = vmatmul.mubr.f32.vlgmr.msra.gmra.mrb[10].mxu1 %v5540_v52 }
 0x419   : > { %8622 = vmatpush3.msra.mxu1 %v5551_v54  ;;  %8623 = vmatprep.mubr.msk.f32.mxu1 %vm9238_vm0, %v9239_v15 }
 0x41a   : > { %8626 = vmatprep.subr.mxu1 %v9239_v15 }
 0x41c   : > { %8594 = vmatmul.mubr.f32.vlgmr.msra.gmra.mrb[10].mxu0 %v9935_v35 }
 0x41d   : > { %8597 = vmatpush3.msra.mxu0 %v5096_v29  ;;  %8598 = vmatprep.mubr.msk.f32.mxu0 %vm9238_vm0, %v9239_v15 }
 0x41e   : > { %8601 = vmatprep.subr.mxu0 %v9239_v15 }
 0x420   : > { %8624 = vmatmul.mubr.f32.vlgmr.msra.gmra.mrb[10].mxu1 %v5536_v42 }
 0x421   : > { %8627 = vmatpush3.msra.mxu1 %v5548_v38  ;;  %8628 = vmatprep.mubr.msk.f32.mxu1 %vm9238_vm0, %v9239_v15 }
 0x422   : > { %8631 = vmatprep.subr.mxu1 %v9239_v15 }
 0x424   : > { %8599 = vmatmul.mubr.f32.vlgmr.msra.gmra.mrb[10].mxu0 %v5085_v39 }
 0x425   : > { %8602 = vmatpush3.msra.mxu0 %v9916_v23  ;;  %8603 = vmatprep.mubr.msk.f32.mxu0 %vm9238_vm0, %v9239_v15 }
 0x426   : > { %8606 = vmatprep.subr.mxu0 %v9239_v15 }
 0x428   : > { %8629 = vmatmul.mubr.f32.vlgmr.msra.gmra.mrb[10].mxu1 %v5537_v46 }
 0x429   : > { %8632 = vmatpush3.msra.mxu1 %v9925_v32  ;;  %8633 = vmatprep.mubr.msk.f32.mxu1 %vm9238_vm0, %v9239_v15 }
 0x42a   : > { %8636 = vmatprep.subr.mxu1 %v9239_v15 }
 0x42c   : > { %8604 = vmatmul.mubr.f32.vlgmr.msra.gmra.mrb[10].mxu0 %v5086_v41 }
 0x42d   : > { %8607 = vmatpush3.msra.mxu0 %v5097_v36  ;;  %8608 = vmatprep.mubr.msk.f32.mxu0 %vm9238_vm0, %v9239_v15 }
 0x42e   : > { %8611 = vmatprep.subr.mxu0 %v9239_v15 }
 0x430   : > { %8634 = vmatmul.mubr.f32.vlgmr.msra.gmra.mrb[10].mxu1 %v5538_v48 }
 0x431   : > { %8637 = vmatpush3.msra.mxu1 %v5549_v20  ;;  %8638 = vmatprep.mubr.msk.f32.mxu1 %vm9238_vm0, %v9239_v15 }
 0x432   : > { %8641 = vmatprep.subr.mxu1 %v9239_v15 }
 0x434   : > { %8609 = vmatmul.mubr.f32.vlgmr.msra.gmra.mrb[10].mxu0 %v9935_v35 }
 0x435   : > { %8612 = vmatpush3.msra.mxu0 %v9916_v23  ;;  %8613 = vmatprep.mubr.msk.f32.mxu0 %vm9238_vm0, %v9239_v15  ;;  %v7348_v23 = vsub.f32 %v5919_v53, %v10055_v18 }
 0x436   : > { %8646 = vmatprep.subr.mxu0 %v9239_v15 }
 0x438   : > { %8639 = vmatmul.mubr.f32.vlgmr.msra.gmra.mrb[10].mxu1 %v5536_v42 }
 0x439   : > { %8642 = vmatpush3.msra.mxu1 %v9925_v32  ;;  %8643 = vmatprep.mubr.msk.f32.mxu1 %vm9238_vm0, %v9239_v15 }
 0x43a   : > { %8676 = vmatprep.subr.mxu1 %v9239_v15 }
 0x43c   : > { %8614 = vmatmul.mubr.f32.vlgmr.msra.gmra.mrb[10].mxu0 %v9935_v35  ;;  %v7349_v35 = vand.u32 4294901760, %v7348_v23 }
 0x43d   : > { %8648 = vmatprep.mubr.msk.f32.mxu0 %vm9238_vm0, %v9239_v15  ;;  %8647 = vmatpush3.msra.mxu0 %v9992_v31 }
 0x43e   : > { %8651 = vmatprep.subr.mxu0 %v9239_v15  ;;  %v7350_v41 = vsub.f32 %v7348_v23, %v7349_v35 }
 0x440   : > { %8644 = vmatmul.mubr.f32.vlgmr.msra.gmra.mrb[10].mxu1 %v5536_v42  ;;  %v7351_v44 = vand.u32 4294901760, %v7350_v41 }
 0x441   : > { %8678 = vmatprep.mubr.msk.f32.mxu1 %vm9238_vm0, %v9239_v15  ;;  %8677 = vmatpush3.msra.mxu1 %v9999_v21 }
 0x442   : > { %8681 = vmatprep.subr.mxu1 %v9239_v15 }
 0x4da   : > { %v4556_v56 = vpop.f32.mrb[8].mxu0 }
 0x4db   : > { %v5921_v57 = vsel %vm2250_vm2, %v4556_v56, 0  ;;  %v8555_v58 = vpop.f32.mrb[9].mxu0 }
 0x4dc   : > { %v5989_v30 = vand.u32 4294901760, %v5921_v57 }
 0x4de   : > { %v5990_v60 = vsub.f32 %v5921_v57, %v5989_v30  ;;  %v5008_v61 = vpop.f32.mrb[8].mxu1 }
 0x4df   : > { %v6370_v63 = vsel %vm2250_vm2, %v5008_v61, 0  ;;  %v8585_v0 = vpop.f32.mrb[9].mxu1 }
 0x4e0   : > { %v5991_v4 = vand.u32 4294901760, %v5990_v60  ;;  %v10007_v5 = vand.u32 4294901760, %v6370_v63 }
 0x4e2   : > { %v5992_v6 = vsub.f32 %v5990_v60, %v5991_v4  ;;  %v6439_v7 = vsub.f32 %v6370_v63, %v10007_v5 }
 0x4e4   : > { %v5993_v9 = vand.u32 4294901760, %v5992_v6  ;;  %v6440_v10 = vand.u32 4294901760, %v6439_v7 }
 0x4e6   : > { %v6441_v45 = vsub.f32 %v6439_v7, %v6440_v10  ;;  %8649 = vmatmul.mubr.f32.vlgmr.msra.gmra.mrb[12].mxu0 %v5993_v9 }
 0x4e7   : > { %8652 = vmatpush3.msra.mxu0 %v6004_v8  ;;  %8653 = vmatprep.mubr.msk.f32.mxu0 %vm9238_vm0, %v9239_v15 }
 0x4e8   : > { %v6442_v12 = vand.u32 4294901760, %v6441_v45  ;;  %8656 = vmatprep.subr.mxu0 %v9239_v15 }
 0x4ea   : > { %8679 = vmatmul.mubr.f32.vlgmr.msra.gmra.mrb[12].mxu1 %v6442_v12 }
 0x4eb   : > { %8682 = vmatpush3.msra.mxu1 %v6453_v11  ;;  %8683 = vmatprep.mubr.msk.f32.mxu1 %vm9238_vm0, %v9239_v15 }
 0x4ec   : > { %8686 = vmatprep.subr.mxu1 %v9239_v15 }
 0x4ee   : > { %8654 = vmatmul.mubr.f32.vlgmr.msra.gmra.mrb[12].mxu0 %v5989_v30 }
 0x4ef   : > { %8657 = vmatpush3.msra.mxu0 %v6001_v55  ;;  %8658 = vmatprep.mubr.msk.f32.mxu0 %vm9238_vm0, %v9239_v15 }
 0x4f0   : > { %8661 = vmatprep.subr.mxu0 %v9239_v15 }
 0x4f2   : > { %8684 = vmatmul.mubr.f32.vlgmr.msra.gmra.mrb[12].mxu1 %v10007_v5 }
 0x4f3   : > { %8687 = vmatpush3.msra.mxu1 %v6450_v59  ;;  %8688 = vmatprep.mubr.msk.f32.mxu1 %vm9238_vm0, %v9239_v15 }
 0x4f4   : > { %8691 = vmatprep.subr.mxu1 %v9239_v15 }
 0x4f6   : > { %8659 = vmatmul.mubr.f32.vlgmr.msra.gmra.mrb[12].mxu0 %v5990_v60 }
 0x4f7   : > { %8662 = vmatpush3.msra.mxu0 %v9992_v31  ;;  %8663 = vmatprep.mubr.msk.f32.mxu0 %vm9238_vm0, %v9239_v15 }
 0x4f8   : > { %8666 = vmatprep.subr.mxu0 %v9239_v15 }
 0x4fa   : > { %8689 = vmatmul.mubr.f32.vlgmr.msra.gmra.mrb[12].mxu1 %v6439_v7 }
 0x4fb   : > { %8692 = vmatpush3.msra.mxu1 %v9999_v21  ;;  %8693 = vmatprep.mubr.msk.f32.mxu1 %vm9238_vm0, %v9239_v15 }
 0x4fc   : > { %8696 = vmatprep.subr.mxu1 %v9239_v15 }
 0x4fe   : > { %8664 = vmatmul.mubr.f32.vlgmr.msra.gmra.mrb[12].mxu0 %v5991_v4 }
 0x4ff   : > { %8667 = vmatpush3.msra.mxu0 %v6002_v26  ;;  %8668 = vmatprep.mubr.msk.f32.mxu0 %vm9238_vm0, %v9239_v15 }
 0x500   : > { %8671 = vmatprep.subr.mxu0 %v9239_v15 }
 0x502   : > { %8694 = vmatmul.mubr.f32.vlgmr.msra.gmra.mrb[12].mxu1 %v6440_v10 }
 0x503   : > { %8697 = vmatpush3.msra.mxu1 %v6451_v2  ;;  %8698 = vmatprep.mubr.msk.f32.mxu1 %vm9238_vm0, %v9239_v15 }
 0x504   : > { %8701 = vmatprep.subr.mxu1 %v9239_v15 }
 0x506   : > { %8669 = vmatmul.mubr.f32.vlgmr.msra.gmra.mrb[12].mxu0 %v5989_v30 }
 0x507   : > { %8672 = vmatpush3.msra.mxu0 %v9992_v31  ;;  %8673 = vmatprep.mubr.msk.f32.mxu0 %vm9238_vm0, %v9239_v15 }
 0x508   : > { %8706 = vmatprep.subr.mxu0 %v9239_v15 }
 0x50a   : > { %8699 = vmatmul.mubr.f32.vlgmr.msra.gmra.mrb[12].mxu1 %v10007_v5 }
 0x50b   : > { %8702 = vmatpush3.msra.mxu1 %v9999_v21  ;;  %8703 = vmatprep.mubr.msk.f32.mxu1 %vm9238_vm0, %v9239_v15 }
 0x50c   : > { %8736 = vmatprep.subr.mxu1 %v9239_v15 }
 0x50e   : > { %8674 = vmatmul.mubr.f32.vlgmr.msra.gmra.mrb[12].mxu0 %v5989_v30 }
 0x50f   : > { %v5460_v19 = vpop.f32.mrb[10].mxu0  ;;  %8707 = vmatpush3.msra.mxu0 %v10044_v3  ;;  %8708 = vmatprep.mubr.msk.f32.mxu0 %vm9238_vm0, %v9239_v15 }
 0x510   : > { %v6819_v43 = vsel %vm2250_vm2, %v5460_v19, 0  ;;  %v8615_v25 = vpop.f32.mrb[11].mxu0  ;;  %8711 = vmatprep.subr.mxu0 %v9239_v15 }
 0x511   : > { %v6887_v27 = vand.u32 4294901760, %v6819_v43 }
 0x512   : > { %8704 = vmatmul.mubr.f32.vlgmr.msra.gmra.mrb[12].mxu1 %v10007_v5 }
 0x513   : > { %v6888_v28 = vsub.f32 %v6819_v43, %v6887_v27  ;;  %v5912_v29 = vpop.f32.mrb[10].mxu1  ;;  %8737 = vmatpush3.msra.mxu1 %v10055_v18  ;;  %8738 = vmatprep.mubr.msk.f32.mxu1 %vm9238_vm0, %v9239_v15 }
 0x514   : > { %v7268_v32 = vsel %vm2250_vm2, %v5912_v29, 0  ;;  %v8645_v33 = vpop.f32.mrb[11].mxu1  ;;  %8741 = vmatprep.subr.mxu1 %v9239_v15 }
 0x515   : > { %v6889_v36 = vand.u32 4294901760, %v6888_v28  ;;  %v7336_v37 = vand.u32 4294901760, %v7268_v32 }
 0x517   : > { %v6890_v38 = vsub.f32 %v6888_v28, %v6889_v36  ;;  %v7337_v39 = vsub.f32 %v7268_v32, %v7336_v37 }
 0x519   : > { %v6891_v42 = vand.u32 4294901760, %v6890_v38  ;;  %v7338_v16 = vand.u32 4294901760, %v7337_v39 }
 0x51b   : > { %v7339_v20 = vsub.f32 %v7337_v39, %v7338_v16  ;;  %8709 = vmatmul.mubr.f32.vlgmr.msra.gmra.mrb[14].mxu0 %v6891_v42 }
 0x51c   : > { %8712 = vmatpush3.msra.mxu0 %v6902_v40  ;;  %8713 = vmatprep.mubr.msk.f32.mxu0 %vm9238_vm0, %v9239_v15 }
 0x51d   : > { %v7340_v46 = vand.u32 4294901760, %v7339_v20  ;;  %8716 = vmatprep.subr.mxu0 %v9239_v15 }
 0x51f   : > { %8739 = vmatmul.mubr.f32.vlgmr.msra.gmra.mrb[14].mxu1 %v7340_v46 }
 0x520   : > { %8742 = vmatpush3.msra.mxu1 %v7351_v44  ;;  %8743 = vmatprep.mubr.msk.f32.mxu1 %vm9238_vm0, %v9239_v15 }
 0x521   : > { %8746 = vmatprep.subr.mxu1 %v9239_v15 }
 0x523   : > { %8714 = vmatmul.mubr.f32.vlgmr.msra.gmra.mrb[14].mxu0 %v6887_v27 }
 0x524   : > { %8717 = vmatpush3.msra.mxu0 %v6899_v14  ;;  %8718 = vmatprep.mubr.msk.f32.mxu0 %vm9238_vm0, %v9239_v15 }
 0x525   : > { %8721 = vmatprep.subr.mxu0 %v9239_v15 }
 0x527   : > { %8744 = vmatmul.mubr.f32.vlgmr.msra.gmra.mrb[14].mxu1 %v7336_v37 }
 0x528   : > { %8747 = vmatpush3.msra.mxu1 %v7348_v23  ;;  %8748 = vmatprep.mubr.msk.f32.mxu1 %vm9238_vm0, %v9239_v15 }
 0x529   : > { %8751 = vmatprep.subr.mxu1 %v9239_v15 }
 0x52b   : > { %8719 = vmatmul.mubr.f32.vlgmr.msra.gmra.mrb[14].mxu0 %v6888_v28 }
 0x52c   : > { %8722 = vmatpush3.msra.mxu0 %v10044_v3  ;;  %8723 = vmatprep.mubr.msk.f32.mxu0 %vm9238_vm0, %v9239_v15 }
 0x52d   : > { %8726 = vmatprep.subr.mxu0 %v9239_v15 }
 0x52f   : > { %8749 = vmatmul.mubr.f32.vlgmr.msra.gmra.mrb[14].mxu1 %v7337_v39 }
 0x530   : > { %8752 = vmatpush3.msra.mxu1 %v10055_v18  ;;  %8753 = vmatprep.mubr.msk.f32.mxu1 %vm9238_vm0, %v9239_v15 }
 0x531   : > { %8756 = vmatprep.subr.mxu1 %v9239_v15 }
 0x533   : > { %8724 = vmatmul.mubr.f32.vlgmr.msra.gmra.mrb[14].mxu0 %v6889_v36 }
 0x534   : > { %8727 = vmatpush3.msra.mxu0 %v6900_v24  ;;  %8728 = vmatprep.mubr.msk.f32.mxu0 %vm9238_vm0, %v9239_v15 }
 0x535   : > { %8731 = vmatprep.subr.mxu0 %v9239_v15 }
 0x537   : > { %8754 = vmatmul.mubr.f32.vlgmr.msra.gmra.mrb[14].mxu1 %v7338_v16 }
 0x538   : > { %8757 = vmatpush3.msra.mxu1 %v7349_v35  ;;  %8758 = vmatprep.mubr.msk.f32.mxu1 %vm9238_vm0, %v9239_v15 }
 0x539   : > { %8761 = vmatprep.subr.mxu1 %v9239_v15 }
 0x53b   : > { %8729 = vmatmul.mubr.f32.vlgmr.msra.gmra.mrb[14].mxu0 %v6887_v27 }
 0x53c   : > { %8732 = vmatpush3.msra.mxu0 %v10044_v3  ;;  %8733 = vmatprep.mubr.msk.f32.mxu0 %vm9238_vm0, %v9239_v15 }
 0x53f   : > { %8759 = vmatmul.mubr.f32.vlgmr.msra.gmra.mrb[14].mxu1 %v7336_v37 }
 0x540   : > { %8762 = vmatpush3.msra.mxu1 %v10055_v18  ;;  %8763 = vmatprep.mubr.msk.f32.mxu1 %vm9238_vm0, %v9239_v15 }
 0x543   : > { %8734 = vmatmul.mubr.f32.vlgmr.msra.gmra.mrb[14].mxu0 %v6887_v27 }
 0x547   : > { %8764 = vmatmul.mubr.f32.vlgmr.msra.gmra.mrb[14].mxu1 %v7336_v37 }
 0x548   : > { %9154 = shalt.err (!%p9151_p3)
}
 0x549   : > { %s9155_s18 = scalar_lea.hbm %s10108_s12, 512  ;;  %s9159_s26 = scalar_lea.hbm %s10196_s6, 1024 }
 0x54a   : > { %p9156_p4 = scmp.ne.s32.totalorder %s10108_s12, %s9155_s18  ;;  %p9160_p9 = scmp.lt.u32.totalorder %s10108_s12, %s10196_s6 }
 0x54b   : > { %p9161_p10 = scmp.lt.u32.totalorder %s9159_s26, %s9155_s18  ;;  %p9163_p12 = scmp.lt.u32.totalorder %s9155_s18, %s10108_s12 }
 0x54c   : > { %p9157_p7 = pnand %p9156_p4, %p9319_p5 }
 0x54d   : > { %p9162_p11 = por %p9161_p10, %p9160_p9 }
 0x54e   : > { %p9158_p8 = pneg %p9157_p7 }
 0x54f   : > { %p9164_p13 = por %p9163_p12, %p9162_p11 }
 0x551   : > { %p9165_p0 = pnand %p9164_p13, %p9158_p8 }
 0x553   : > { %9168 = shalt.err (!%p9165_p0)
}
 0x554   : > { %s9243_s10 = smov 128   ;;  %s9244_s15 = smov 8   ;;  %v7869_v56 = vld [vmem:[%s10194_s4] ss:$0 sm:$0xff] }
 0x555   : > { %9075 = dma.vmem_to_hbm [thread:$0]  (%p9319_p5), %s10103_s28, 512, %s10108_s12, %s7738_s14, %s9243_s10, %s9243_s10, %s9244_s15  }
 0x556   : > { %s7862_s16 = sshll.u32 %s9858_s11, 3  ;;  %s7872_s14 = sshll.u32 %s9302_s25, 7 }
 0x557   : > { %s246_s17 = scalar_lea.vmem [#allocation2], %s7862_s16  ;;  %s10146_s20 = scalar_lea.hbm %s10195_s5, %s7872_s14 }
 0x558   : > { %s7751_s13 = sshll.u32 %s246_s17, 4  ;;  %s7733_s26 = scalar_lea.sflag [#allocation3], %s9858_s11  ;;  %s10148_s13 = int_to_ptr.vmem [resolvable:$true] %s7751_s13 }
 0x559   : > { %s9169_s29 = scalar_lea.vmem %s10148_s13, 128  ;;  %s9245_s25 = smov [#allocation2]  }
 0x55a   : > { %p9170_p1 = scmp.ne.s32.totalorder %s10148_s13, %s9169_s29  ;;  %s9173_s9 = sshll.u32 %s9245_s25, 4  ;;  %s9174_s9 = int_to_ptr.vmem [resolvable:$false] %s9173_s9 }
 0x55b   : > { %s9175_s10 = scalar_lea.vmem %s9174_s9, 256  ;;  %p9176_p4 = scmp.lt.s32.totalorder %s10148_s13, %s9174_s9 }
 0x55c   : > { %p9171_p2 = pnand %p9170_p1, %p9319_p5  ;;  %p9177_p7 = scmp.lt.s32.totalorder %s9175_s10, %s9169_s29 }
 0x55e   : > { %p9172_p3 = pneg %p9171_p2  ;;  %p9178_p8 = por %p9177_p7, %p9176_p4 }
 0x560   : > { %p9179_p9 = pnand %p9178_p8, %p9172_p3 }
 0x5e1   : > { %v6365_v15 = vpop.f32.mrb[12].mxu0 }
 0x5e2   : > { %v8675_v47 = vpop.f32.mrb[13].mxu0  ;;  %v7716_v49 = vsel %vm303_vm1, %v6365_v15, 0.0 }
 0x5e5   : > { %v6814_v48 = vpop.f32.mrb[12].mxu1 }
 0x5e6   : > { %v7717_v50 = vsel %vm303_vm1, %v6814_v48, 0.0  ;;  %v8705_v51 = vpop.f32.mrb[13].mxu1 }
 0x5e7   : > { %v7718_v52 = vadd.f32 %v7717_v50, %v7716_v49 }
 0x616   : > { %v7263_v54 = vpop.f32.mrb[14].mxu0 }
 0x617   : > { %v7719_v22 = vsel %vm303_vm1, %v7263_v54, 0.0  ;;  %v8735_v31 = vpop.f32.mrb[15].mxu0 }
 0x618   : > { %v7720_v17 = vadd.f32 %v7719_v22, %v7718_v52 }
 0x61a   : > { %v7712_v21 = vpop.f32.mrb[14].mxu1 }
 0x61b   : > { %v7721_v55 = vsel %vm303_vm1, %v7712_v21, 0.0  ;;  %v8765_v57 = vpop.f32.mrb[15].mxu1 }
 0x61c   : > { %v7722_v58 = vadd.f32 %v7721_v55, %v7720_v17 }
 0x61e   : > { %v7730_v59 = vadd.f32 %v7869_v56, %v7722_v58 }
 0x620   : > { %7731 = vst.msk [vmem:[%s246_s17] sm:$0xff] %vm303_vm1, %v7730_v59 }
 0x621   : > { %9182 = shalt.err (!%p9179_p9)
}
 0x622   : > { %s9183_s11 = scalar_lea.hbm %s10146_s20, 128  ;;  %s9187_s28 = scalar_lea.hbm %s10195_s5, 256 }
 0x623   : > { %p9184_p10 = scmp.ne.s32.totalorder %s10146_s20, %s9183_s11  ;;  %p9188_p13 = scmp.lt.u32.totalorder %s10146_s20, %s10195_s5 }
 0x624   : > { %p9189_p0 = scmp.lt.u32.totalorder %s9187_s28, %s9183_s11  ;;  %p9191_p2 = scmp.lt.u32.totalorder %s9183_s11, %s10146_s20 }
 0x625   : > { %p9185_p11 = pnand %p9184_p10, %p9319_p5 }
 0x626   : > { %p9190_p1 = por %p9189_p0, %p9188_p13 }
 0x627   : > { %p9186_p12 = pneg %p9185_p11 }
 0x628   : > { %p9192_p3 = por %p9191_p2, %p9190_p1 }
 0x62a   : > { %p9193_p4 = pnand %p9192_p3, %p9186_p12 }
 0x62c   : > { %9196 = shalt.err (!%p9193_p4)
}
 0x62d   : > { %9074 = dma.vmem_to_hbm [thread:$0]  (%p9319_p5), %s10148_s13, 128, %s10146_s20, %s7733_s26  }
 0x62e PF: > { %p9085_p7 = scmp.ge.s32.totalorder %s9235_s24, 2  ;;  %s7779_s17 = sand.u32 1, %s9223_s21  }
 0x62f   : > { %s7780_s18 = scalar_lea.sflag [#allocation3], %s7779_s17 }
 0x630   : > { %p9079_p8 = pnand %p9085_p7, %p9323_p6 }
 0x632   : > { %9214 = dma.done.wait (!%p9079_p8), %s7780_s18, 128  }
 0x633   : > { %9216 = vsyncadd (!%p9079_p8), %s7780_s18, 4294967168  ;;  %s7789_s19 = scalar_lea.sflag [#allocation5], %s7779_s17 }
 0x634   : > { %9218 = dma.done.wait (!%p9079_p8), %s7789_s19, 512  }
 0x635   : > { %9220 = vsyncadd (!%p9079_p8), %s7789_s19, 4294966784  ;;  %p20_p5 = scmp.ge.s32.totalorder %s9306_s27, 4   ;;  %s10199_s21 = smov %s9227_s22 }
 0x636   : > { %s10200_s22 = smov %s9231_s23  ;;  %s10201_s23 = smov %s9317_s30 }
 0x637   : > { %s10202_s24 = smov %s9306_s27  ;;  %22 = sbr.rel (!%p20_p5) target bundleno = 5 (0x5), region = 92 }
 0x63e   :  { %7794 = vsyncpa [#allocation3], 1 }
 0x63f   :  { %7796 = vsyncpa [#allocation3 + $0x1], 1 }
 0x640   :  { %7797 = vsyncpa [#allocation5], 1 }
 0x641   :  { %7799 = vsyncpa [#allocation5 + $0x1], 1 }

</bundles_post_ra>
